<compile_context>
chip_gen: v5e
topology: v5e:2x2
jax: 0.10.0
libtpu: 0.0.40
codegen_flags: <defaults>
</compile_context>

<pallas_src>
import math
import functools

import jax
import jax.numpy as jnp
from jax import lax
from jax.experimental import pallas as pl
from jax.experimental.pallas import tpu as pltpu

_LN_EPS = 1e-5
_VMEM_LIMIT_CACHE = None


def _vmem_limit_bytes():
    """Adaptive scoped-VMEM limit: ~half physical, clamped to [32, 96] MiB."""
    global _VMEM_LIMIT_CACHE
    if _VMEM_LIMIT_CACHE is None:
        try:
            cap = pltpu.get_tpu_info().vmem_capacity_bytes
            lim = max(32 * 1024 * 1024, min(cap // 2, 96 * 1024 * 1024))
        except Exception:
            lim = 32 * 1024 * 1024
        _VMEM_LIMIT_CACHE = int(lim)
    return _VMEM_LIMIT_CACHE


# ----------------------------- Pallas kernels -----------------------------

def fused_attn_ln_kernel(x_ref, wqkv_ref, bqkv_ref, wout_ref, bout_ref,
                         bias_ref, g_ref, b_ref, o_ref, w_ref,
                         qkv_scr, ctx_scr, *, num_heads, q_tile):
    """One (batch, q-tile) step: QKV proj (once/batch) -> MHA over q-tile ->
    out proj -> +residual -> LN0.

    x_ref:    (1, T, D) f32 activations (also the residual)
    wqkv_ref: (D, 3D) bf16 (query scale pre-folded), bqkv_ref: (1, 3D) f32
    wout_ref: (D, D)  bf16,                          bout_ref: (1, D)  f32
    bias_ref: (1, 1, T) additive key-padding bias (f32)
    g_ref/b_ref: (1, D) LayerNorm0 gamma/beta
    o_ref:    (1, tq, D) output, w_ref: (1, tq, T) head-averaged attention
    qkv_scr:  (T, 3D) bf16 persistent scratch (QKV for the whole sequence)
    ctx_scr:  (tq, D) bf16 scratch for the concatenated head outputs
    """
    T = x_ref.shape[1]
    D = x_ref.shape[2]
    H = num_heads
    Dh = D // H
    qi = pl.program_id(1)

    # QKV projection for the whole sequence, once per batch element; cast to
    # bf16 ONCE right after the bias add (review item #1).
    @pl.when(qi == 0)
    def _():
        x_bf = x_ref[0].astype(jnp.bfloat16)                         # (T, D)
        qkv = jnp.dot(x_bf, wqkv_ref[...],
                      preferred_element_type=jnp.float32) + bqkv_ref[...]
        qkv_scr[...] = qkv.astype(jnp.bfloat16)                      # (T, 3D)

    q_start = pl.multiple_of(qi * q_tile, q_tile)
    q_rows = qkv_scr[pl.ds(q_start, q_tile), pl.ds(0, D)]            # (tq, D) bf16
    bias = bias_ref[0]                                               # (1, T) f32

    # H is small & static -> unrolled loop; all temporaries are (tq, T)-sized.
    # TODO(synk): flash-style KV streaming for very long T.
    for h in range(H):
        q = q_rows[:, h * Dh:(h + 1) * Dh]                           # (tq, Dh)
        k = qkv_scr[:, D + h * Dh:D + (h + 1) * Dh]                  # (T, Dh)
        v = qkv_scr[:, 2 * D + h * Dh:2 * D + (h + 1) * Dh]          # (T, Dh)

        s = lax.dot_general(q, k, (((1,), (1,)), ((), ())),
                            preferred_element_type=jnp.float32)      # (tq, T)
        s = s + bias
        m = jnp.max(s, axis=-1, keepdims=True)
        e = jnp.exp(s - m)
        p = e / jnp.sum(e, axis=-1, keepdims=True)                   # exact softmax

        # accumulate head-averaged weights straight into the output ref
        # (raw p accumulation, scaled once at the end; review item).
        if h == 0:
            w_ref[0] = p
        else:
            w_ref[0] = w_ref[0] + p

        ctx_scr[:, h * Dh:(h + 1) * Dh] = jnp.dot(
            p.astype(jnp.bfloat16), v,
            preferred_element_type=jnp.float32).astype(jnp.bfloat16)
    w_ref[0] = w_ref[0] * (1.0 / H)

    attn_out = jnp.dot(ctx_scr[...], wout_ref[...],
                       preferred_element_type=jnp.float32) + bout_ref[...]

    # residual add + LayerNorm0 (f32)
    resid = x_ref[0, pl.ds(q_start, q_tile), :]                      # (tq, D) f32
    y = resid + attn_out
    mu = jnp.mean(y, axis=-1, keepdims=True)
    yc = y - mu
    var = jnp.mean(yc * yc, axis=-1, keepdims=True)
    inv = lax.rsqrt(var + _LN_EPS)
    o_ref[0] = (yc * inv * g_ref[...] + b_ref[...]).astype(o_ref.dtype)


def fused_ffn_ln_kernel(x_ref, w1_ref, b1_ref, w2_ref, b2_ref, g_ref, b_ref,
                        o_ref, acc_ref):
    """(row-tile, F-tile) step: accumulate fc2(relu(fc1(x))) column tiles,
    then +residual(x) -> LayerNorm1 on the last F step."""
    j = pl.program_id(1)

    @pl.when(j == 0)
    def _():
        acc_ref[...] = jnp.zeros_like(acc_ref)

    x_bf = x_ref[...].astype(jnp.bfloat16)                           # (tm, D)
    h = jnp.dot(x_bf, w1_ref[...],
                preferred_element_type=jnp.float32) + b1_ref[...]    # (tm, tf)
    h = jnp.maximum(h, 0.0).astype(jnp.bfloat16)                     # bf16 relu
    acc_ref[...] += jnp.dot(h, w2_ref[...],
                            preferred_element_type=jnp.float32)      # (tm, D)

    @pl.when(j == pl.num_programs(1) - 1)
    def _():
        x = x_ref[...]                                               # residual
        z = x + acc_ref[...] + b2_ref[...]
        mu = jnp.mean(z, axis=-1, keepdims=True)
        zc = z - mu
        var = jnp.mean(zc * zc, axis=-1, keepdims=True)
        inv = lax.rsqrt(var + _LN_EPS)
        o_ref[...] = (zc * inv * g_ref[...] + b_ref[...]).astype(o_ref.dtype)


# ----------------------------- pallas_call wrappers -----------------------------

def fused_attention_block(x_btd, w_qkv, b_qkv, w_out, b_out, bias,
                          ln_g, ln_b, *, num_heads, q_tile=256):
    B, T, D = x_btd.shape
    tq = q_tile if (q_tile % 8 == 0 and T % q_tile == 0) else T
    nq = T // tq
    kernel = functools.partial(fused_attn_ln_kernel,
                               num_heads=num_heads, q_tile=tq)
    in_specs = [
        pl.BlockSpec((1, T, D), lambda b, q: (b, 0, 0)),        # x (residual)
        pl.BlockSpec((D, 3 * D), lambda b, q: (0, 0)),          # w_qkv (bf16)
        pl.BlockSpec((1, 3 * D), lambda b, q: (0, 0)),          # b_qkv
        pl.BlockSpec((D, D), lambda b, q: (0, 0)),              # w_out (bf16)
        pl.BlockSpec((1, D), lambda b, q: (0, 0)),              # b_out
        pl.BlockSpec((1, 1, T), lambda b, q: (b, 0, 0)),        # key-pad bias
        pl.BlockSpec((1, D), lambda b, q: (0, 0)),              # ln0 gamma
        pl.BlockSpec((1, D), lambda b, q: (0, 0)),              # ln0 beta
    ]
    out_specs = (
        pl.BlockSpec((1, tq, D), lambda b, q: (b, q, 0)),       # x1 tile
        pl.BlockSpec((1, tq, T), lambda b, q: (b, q, 0)),       # head-avg weights
    )
    out_shape = (jax.ShapeDtypeStruct((B, T, D), x_btd.dtype),
                 jax.ShapeDtypeStruct((B, T, T), jnp.float32))
    return pl.pallas_call(
        kernel,
        grid=(B, nq),
        in_specs=in_specs,
        out_specs=out_specs,
        out_shape=out_shape,
        scratch_shapes=[pltpu.VMEM((T, 3 * D), jnp.bfloat16),   # QKV (per batch)
                        pltpu.VMEM((tq, D), jnp.bfloat16)],     # head outputs
        compiler_params=pltpu.CompilerParams(
            dimension_semantics=("parallel", "arbitrary"),
            vmem_limit_bytes=_vmem_limit_bytes()),
    )(x_btd, w_qkv, b_qkv, w_out, b_out, bias, ln_g, ln_b)


def fused_ffn_block(x2d, w1, b1, w2, b2, ln_g, ln_b, *, row_tile=1024,
                    f_tile=2048):
    rows, D = x2d.shape
    F = w1.shape[1]
    tm = rows if rows <= row_tile else row_tile
    tf = f_tile if (F % f_tile == 0) else F          # F axis must tile exactly
    grid = (pl.cdiv(rows, tm), F // tf)
    in_specs = [
        pl.BlockSpec((tm, D), lambda i, j: (i, 0)),             # x (residual)
        pl.BlockSpec((D, tf), lambda i, j: (0, j)),             # w_fc1 col tile
        pl.BlockSpec((1, tf), lambda i, j: (0, j)),             # b_fc1 tile
        pl.BlockSpec((tf, D), lambda i, j: (j, 0)),             # w_fc2 row tile
        pl.BlockSpec((1, D), lambda i, j: (0, 0)),              # b_fc2
        pl.BlockSpec((1, D), lambda i, j: (0, 0)),              # ln1 gamma
        pl.BlockSpec((1, D), lambda i, j: (0, 0)),              # ln1 beta
    ]
    return pl.pallas_call(
        fused_ffn_ln_kernel,
        grid=grid,
        in_specs=in_specs,
        out_specs=pl.BlockSpec((tm, D), lambda i, j: (i, 0)),
        out_shape=jax.ShapeDtypeStruct((rows, D), x2d.dtype),
        scratch_shapes=[pltpu.VMEM((tm, D), jnp.float32)],      # fc2 accumulator
        compiler_params=pltpu.CompilerParams(
            dimension_semantics=("parallel", "arbitrary"),
            vmem_limit_bytes=_vmem_limit_bytes()),
    )(x2d, w1, b1, w2, b2, ln_g, ln_b)


# ----------------------------- Parameters -----------------------------

def init_params(key, embed_dim, ffn_dim):
    ks = jax.random.split(key, 4)

    def xavier(k, shape):
        limit = math.sqrt(6.0 / (shape[0] + shape[1]))
        return jax.random.uniform(k, shape, jnp.float32, -limit, limit)

    d = embed_dim
    return dict(
        w_qkv=xavier(ks[0], (d, 3 * d)), b_qkv=jnp.zeros((1, 3 * d), jnp.float32),
        w_out=xavier(ks[1], (d, d)),     b_out=jnp.zeros((1, d), jnp.float32),
        w_fc1=xavier(ks[2], (d, ffn_dim)), b_fc1=jnp.zeros((1, ffn_dim), jnp.float32),
        w_fc2=xavier(ks[3], (ffn_dim, d)), b_fc2=jnp.zeros((1, d), jnp.float32),
        ln0_g=jnp.ones((1, d), jnp.float32), ln0_b=jnp.zeros((1, d), jnp.float32),
        ln1_g=jnp.ones((1, d), jnp.float32), ln1_b=jnp.zeros((1, d), jnp.float32),
    )


# ----------------------------- Forward pass -----------------------------

@functools.partial(jax.jit, static_argnames=("num_heads",))
def nstack_merge_encoder_layer(params, x_le, x_no, ntree_mask, hier_embed,
                               pad_mask, key_pad, node_pad, *, num_heads):
    del ntree_mask, hier_embed, pad_mask  # TODO(synk): dptree-specific inputs unused.
    n, b, d = x_le.shape
    m = x_no.shape[0]
    T = n + m
    H = num_heads
    Dh = d // H

    # merged sequence; batch-major (B, T, D) so the attention kernel gets clean
    # (1, T, D) blocks per grid step.
    x = jnp.concatenate([x_le, x_no], axis=0)            # (T, B, D)
    x_btd = jnp.transpose(x, (1, 0, 2))                  # (B, T, D)
    # normalize_before = False -> post-norm; dropouts are identity in eval.

    # Fold the Dh**-0.5 query scale into the Q columns of w_qkv / b_qkv (free),
    # cast matmul weights to bf16 (f32 accumulation inside the kernels).
    scale = Dh ** -0.5
    q_scale = jnp.concatenate(
        [jnp.full((1, d), scale, jnp.float32), jnp.ones((1, 2 * d), jnp.float32)],
        axis=1)                                          # (1, 3D)
    w_qkv = (params['w_qkv'] * q_scale).astype(jnp.bfloat16)
    b_qkv = params['b_qkv'] * q_scale
    w_out = params['w_out'].astype(jnp.bfloat16)
    w_fc1 = params['w_fc1'].astype(jnp.bfloat16)
    w_fc2 = params['w_fc2'].astype(jnp.bfloat16)

    # key padding bias over the merged sequence (True = padded)
    kp = jnp.concatenate([key_pad, node_pad], axis=1)    # (B, T)
    bias = jnp.where(kp, -1e9, 0.0).astype(jnp.float32)[:, None, :]   # (B,1,T)

    # --- fused attention + out-proj + residual + LN0 (head-avg weights in-kernel)
    x1, weights = fused_attention_block(
        x_btd, w_qkv, b_qkv, w_out, params['b_out'], bias,
        params['ln0_g'], params['ln0_b'], num_heads=H)   # (B,T,D), (B,T,T)

    # --- fused FFN (hidden dim streamed) + residual + LN1 on flattened rows
    x2 = fused_ffn_block(x1.reshape(b * T, d), w_fc1, params['b_fc1'],
                         w_fc2, params['b_fc2'],
                         params['ln1_g'], params['ln1_b'])

    out = jnp.transpose(x2.reshape(b, T, d), (1, 0, 2))  # back to (T, B, D)
    return out[:n], out[n:], weights


# ----------------------------- Pure-JAX reference (f32) -----------------------------

def reference_layer(params, x_le, x_no, key_pad, node_pad, num_heads):
    n = x_le.shape[0]
    x = jnp.concatenate([x_le, x_no], axis=0)            # (T, B, D)
    T, B, D = x.shape
    H = num_heads
    Dh = D // H
    resid = x
    xt = jnp.transpose(x, (1, 0, 2))                     # (B, T, D)
    qkv = xt @ params['w_qkv'] + params['b_qkv'][0]
    q, k, v = jnp.split(qkv, 3, axis=-1)
    q = q * (Dh ** -0.5)

    def heads(a):
        return a.reshape(B, T, H, Dh).transpose(0, 2, 1, 3)

    qh, kh, vh = heads(q), heads(k), heads(v)
    s = jnp.einsum('bhqd,bhkd->bhqk', qh, kh)
    kp = jnp.concatenate([key_pad, node_pad], axis=1)
    s = s + jnp.where(kp, -1e9, 0.0)[:, None, None, :]
    p = jax.nn.softmax(s, axis=-1)
    ctx = jnp.einsum('bhqk,bhkd->bhqd', p, vh).transpose(0, 2, 1, 3).reshape(B, T, D)
    attn = ctx @ params['w_out'] + params['b_out'][0]
    attn = jnp.transpose(attn, (1, 0, 2))                # (T, B, D)

    def ln(z, g, b):
        mu = z.mean(-1, keepdims=True)
        var = ((z - mu) ** 2).mean(-1, keepdims=True)
        return (z - mu) / jnp.sqrt(var + _LN_EPS) * g[0] + b[0]

    x1 = ln(resid + attn, params['ln0_g'], params['ln0_b'])
    h = jax.nn.relu(x1 @ params['w_fc1'] + params['b_fc1'][0])
    x2 = h @ params['w_fc2'] + params['b_fc2'][0]
    x2 = ln(x1 + x2, params['ln1_g'], params['ln1_b'])
    return x2[:n], x2[n:], p.mean(axis=1)


# ----------------------------- Demo -----------------------------

if __name__ == "__main__":
    # small shapes consistent with the module's forward
    n, m, b = 8, 8, 2            # leaves, nodes, batch
    embed_dim = 32
    num_heads = 4
    ffn_dim = 64

    key = jax.random.PRNGKey(0)
    k1, k2, k3 = jax.random.split(key, 3)

    x_le = jax.random.normal(k1, (n, b, embed_dim), jnp.float32)
    x_no = jax.random.normal(k2, (m, b, embed_dim), jnp.float32)

    # padding masks: True = padded position
    key_pad = jnp.zeros((b, n), jnp.bool_).at[1, -2:].set(True)
    node_pad = jnp.zeros((b, m), jnp.bool_).at[1, -1:].set(True)

    # tree-specific inputs (accepted but unused; see TODO above)
    ntree_mask = jnp.ones((b, m, n), jnp.bool_)
    hier_embed = jnp.zeros((b, m, n, embed_dim), jnp.float32)
    pad_mask = jnp.zeros((b, n + m), jnp.bool_)

    params = init_params(k3, embed_dim, ffn_dim)

    o_le, o_no, weights = nstack_merge_encoder_layer(
        params, x_le, x_no, ntree_mask, hier_embed, pad_mask,
        key_pad, node_pad, num_heads=num_heads)
    jax.block_until_ready((o_le, o_no, weights))

    assert o_le.shape == (n, b, embed_dim)
    assert o_no.shape == (m, b, embed_dim)
    assert weights.shape == (b, n + m, n + m)
    assert jnp.all(jnp.isfinite(o_le)) and jnp.all(jnp.isfinite(o_no))
    assert jnp.all(jnp.isfinite(weights))

    # compare against the pure-JAX f32 reference (loose tolerance: bf16 MXU)
    r_le, r_no, r_w = reference_layer(params, x_le, x_no, key_pad, node_pad,
                                      num_heads)
    d_le = float(jnp.max(jnp.abs(o_le - r_le)))
    d_no = float(jnp.max(jnp.abs(o_no - r_no)))
    d_w = float(jnp.max(jnp.abs(weights - r_w)))
    assert d_le < 0.2 and d_no < 0.2, (d_le, d_no)
    assert d_w < 0.05, d_w

    print("KERNEL_OK")
</pallas_src>

<mosaic_0001>
module attributes {stable_mosaic.version = 11 : i64} {
  func.func @fused_ffn_ln_kernel(%arg0: i32, %arg1: i32, %arg2: memref<32x32xf32, #tpu.memory_space<vmem>>, %arg3: memref<32x64xbf16, #tpu.memory_space<vmem>>, %arg4: memref<1x64xf32, #tpu.memory_space<vmem>>, %arg5: memref<64x32xbf16, #tpu.memory_space<vmem>>, %arg6: memref<1x32xf32, #tpu.memory_space<vmem>>, %arg7: memref<1x32xf32, #tpu.memory_space<vmem>>, %arg8: memref<1x32xf32, #tpu.memory_space<vmem>>, %arg9: memref<32x32xf32, #tpu.memory_space<vmem>>, %arg10: memref<32x32xf32, #tpu.memory_space<vmem>>) attributes {dimension_semantics = [#tpu.dimension_semantics<parallel>, #tpu.dimension_semantics<arbitrary>], iteration_bounds = array<i64: 1, 1>, scalar_prefetch = 0 : i64, scratch_operands = 1 : i64, tpu.core_type = #tpu.core_type<tc>, window_params = [{transform_indices = @transform_0, window_bounds = array<i64: 32, 32>}, {transform_indices = @transform_1, window_bounds = array<i64: 32, 64>}, {transform_indices = @transform_2, window_bounds = array<i64: 1, 64>}, {transform_indices = @transform_3, window_bounds = array<i64: 64, 32>}, {pipeline_mode = #tpu.pipeline_mode<synchronous>, transform_indices = @transform_4, window_bounds = array<i64: 1, 32>}, {pipeline_mode = #tpu.pipeline_mode<synchronous>, transform_indices = @transform_5, window_bounds = array<i64: 1, 32>}, {pipeline_mode = #tpu.pipeline_mode<synchronous>, transform_indices = @transform_6, window_bounds = array<i64: 1, 32>}, {transform_indices = @transform_7, window_bounds = array<i64: 32, 32>}]} {
    %c0_i32 = arith.constant 0 : i32
    %0 = arith.cmpi eq, %arg1, %c0_i32 : i32
    %1 = arith.extui %0 : i1 to i32
    %c0_i32_0 = arith.constant 0 : i32
    %2 = arith.cmpi ne, %1, %c0_i32_0 : i32
    scf.if %2 {
      %cst_16 = arith.constant 0.000000e+00 : f32
      %21 = vector.broadcast %cst_16 : f32 to vector<32x32xf32>
      %c0_17 = arith.constant 0 : index
      %c0_18 = arith.constant 0 : index
      %22 = vector.load %arg10[%c0_17, %c0_18] : memref<32x32xf32, #tpu.memory_space<vmem>>, vector<32x32xf32>
      tpu.vector_store %arg10[%c0_17, %c0_18], %21 {strides = array<i32>} : memref<32x32xf32, #tpu.memory_space<vmem>>, vector<32x32xf32>,
    } else {
    }
    %c0 = arith.constant 0 : index
    %c0_1 = arith.constant 0 : index
    %3 = vector.load %arg2[%c0, %c0_1] : memref<32x32xf32, #tpu.memory_space<vmem>>, vector<32x32xf32>
    %4 = arith.truncf %3 : vector<32x32xf32> to vector<32x32xbf16>
    %c0_2 = arith.constant 0 : index
    %c0_3 = arith.constant 0 : index
    %5 = vector.load %arg3[%c0_2, %c0_3] : memref<32x64xbf16, #tpu.memory_space<vmem>>, vector<32x64xbf16>
    %cst = arith.constant dense<0.000000e+00> : vector<32x64xf32>
    %6 = tpu.matmul %4, %5, %cst {dimension_numbers = #tpu.dot_dimension_numbers<[1], [0], [0], [1], [0, 0, 1, 1], [], []>} : vector<32x32xbf16>, vector<32x64xbf16>, vector<32x64xf32> -> vector<32x64xf32>
    %c0_4 = arith.constant 0 : index
    %c0_5 = arith.constant 0 : index
    %7 = vector.load %arg4[%c0_4, %c0_5] : memref<1x64xf32, #tpu.memory_space<vmem>>, vector<1x64xf32>
    %8 = vector.broadcast %7 : vector<1x64xf32> to vector<32x64xf32>
    %9 = arith.addf %6, %8 : vector<32x64xf32>
    %cst_6 = arith.constant 0.000000e+00 : f32
    %10 = vector.broadcast %cst_6 : f32 to vector<32x64xf32>
    %11 = arith.maximumf %9, %10 : vector<32x64xf32>
    %12 = arith.truncf %11 : vector<32x64xf32> to vector<32x64xbf16>
    %c0_7 = arith.constant 0 : index
    %c0_8 = arith.constant 0 : index
    %13 = vector.load %arg10[%c0_7, %c0_8] : memref<32x32xf32, #tpu.memory_space<vmem>>, vector<32x32xf32>
    %c0_9 = arith.constant 0 : index
    %c0_10 = arith.constant 0 : index
    %14 = vector.load %arg5[%c0_9, %c0_10] : memref<64x32xbf16, #tpu.memory_space<vmem>>, vector<64x32xbf16>
    %cst_11 = arith.constant dense<0.000000e+00> : vector<32x32xf32>
    %15 = tpu.matmul %12, %14, %cst_11 {dimension_numbers = #tpu.dot_dimension_numbers<[1], [0], [0], [1], [0, 0, 1, 1], [], []>} : vector<32x64xbf16>, vector<64x32xbf16>, vector<32x32xf32> -> vector<32x32xf32>
    %16 = arith.addf %13, %15 : vector<32x32xf32>
    %c0_12 = arith.constant 0 : index
    %c0_13 = arith.constant 0 : index
    %17 = vector.load %arg10[%c0_12, %c0_13] : memref<32x32xf32, #tpu.memory_space<vmem>>, vector<32x32xf32>
    tpu.vector_store %arg10[%c0_12, %c0_13], %16 {strides = array<i32>} : memref<32x32xf32, #tpu.memory_space<vmem>>, vector<32x32xf32>,
    %c0_i32_14 = arith.constant 0 : i32
    %18 = arith.cmpi eq, %arg1, %c0_i32_14 : i32
    %19 = arith.extui %18 : i1 to i32
    %c0_i32_15 = arith.constant 0 : i32
    %20 = arith.cmpi ne, %19, %c0_i32_15 : i32
    scf.if %20 {
      %c0_16 = arith.constant 0 : index
      %c0_17 = arith.constant 0 : index
      %21 = vector.load %arg2[%c0_16, %c0_17] : memref<32x32xf32, #tpu.memory_space<vmem>>, vector<32x32xf32>
      %c0_18 = arith.constant 0 : index
      %c0_19 = arith.constant 0 : index
      %22 = vector.load %arg10[%c0_18, %c0_19] : memref<32x32xf32, #tpu.memory_space<vmem>>, vector<32x32xf32>
      %23 = arith.addf %21, %22 : vector<32x32xf32>
      %c0_20 = arith.constant 0 : index
      %c0_21 = arith.constant 0 : index
      %24 = vector.load %arg6[%c0_20, %c0_21] : memref<1x32xf32, #tpu.memory_space<vmem>>, vector<1x32xf32>
      %25 = vector.broadcast %24 : vector<1x32xf32> to vector<32x32xf32>
      %26 = arith.addf %23, %25 : vector<32x32xf32>
      %cst_22 = arith.constant dense<0.000000e+00> : vector<32xf32>
      %27 = vector.multi_reduction <add>, %26, %cst_22 [1] : vector<32x32xf32> to vector<32xf32>
      %28 = vector.shape_cast %27 : vector<32xf32> to vector<32x1xf32>
      %cst_23 = arith.constant 3.200000e+01 : f32
      %29 = vector.broadcast %cst_23 : f32 to vector<32x1xf32>
      %30 = arith.divf %28, %29 : vector<32x1xf32>
      %31 = vector.broadcast %30 : vector<32x1xf32> to vector<32x32xf32>
      %32 = arith.subf %26, %31 : vector<32x32xf32>
      %33 = arith.mulf %32, %32 : vector<32x32xf32>
      %cst_24 = arith.constant dense<0.000000e+00> : vector<32xf32>
      %34 = vector.multi_reduction <add>, %33, %cst_24 [1] : vector<32x32xf32> to vector<32xf32>
      %35 = vector.shape_cast %34 : vector<32xf32> to vector<32x1xf32>
      %cst_25 = arith.constant 3.200000e+01 : f32
      %36 = vector.broadcast %cst_25 : f32 to vector<32x1xf32>
      %37 = arith.divf %35, %36 : vector<32x1xf32>
      %cst_26 = arith.constant 9.99999974E-6 : f32
      %38 = vector.broadcast %cst_26 : f32 to vector<32x1xf32>
      %39 = arith.addf %37, %38 : vector<32x1xf32>
      %40 = math.rsqrt %39 : vector<32x1xf32>
      %41 = vector.broadcast %40 : vector<32x1xf32> to vector<32x32xf32>
      %42 = arith.mulf %32, %41 : vector<32x32xf32>
      %c0_27 = arith.constant 0 : index
      %c0_28 = arith.constant 0 : index
      %43 = vector.load %arg7[%c0_27, %c0_28] : memref<1x32xf32, #tpu.memory_space<vmem>>, vector<1x32xf32>
      %44 = vector.broadcast %43 : vector<1x32xf32> to vector<32x32xf32>
      %45 = arith.mulf %42, %44 : vector<32x32xf32>
      %c0_29 = arith.constant 0 : index
      %c0_30 = arith.constant 0 : index
      %46 = vector.load %arg8[%c0_29, %c0_30] : memref<1x32xf32, #tpu.memory_space<vmem>>, vector<1x32xf32>
      %47 = vector.broadcast %46 : vector<1x32xf32> to vector<32x32xf32>
      %48 = arith.addf %45, %47 : vector<32x32xf32>
      %c0_31 = arith.constant 0 : index
      %c0_32 = arith.constant 0 : index
      %49 = vector.load %arg9[%c0_31, %c0_32] : memref<32x32xf32, #tpu.memory_space<vmem>>, vector<32x32xf32>
      tpu.vector_store %arg9[%c0_31, %c0_32], %48 {strides = array<i32>} : memref<32x32xf32, #tpu.memory_space<vmem>>, vector<32x32xf32>,
    } else {
    }
    return
  }
  func.func @transform_0(%arg0: i32, %arg1: i32) -> (i32, i32) {
    %c0_i32 = arith.constant 0 : i32
    %c0_i32_0 = arith.constant 0 : i32
    return %arg0, %c0_i32 : i32, i32
  }
  func.func @transform_1(%arg0: i32, %arg1: i32) -> (i32, i32) {
    %c0_i32 = arith.constant 0 : i32
    %c0_i32_0 = arith.constant 0 : i32
    return %c0_i32, %arg1 : i32, i32
  }
  func.func @transform_2(%arg0: i32, %arg1: i32) -> (i32, i32) {
    %c0_i32 = arith.constant 0 : i32
    %c0_i32_0 = arith.constant 0 : i32
    return %c0_i32, %arg1 : i32, i32
  }
  func.func @transform_3(%arg0: i32, %arg1: i32) -> (i32, i32) {
    %c0_i32 = arith.constant 0 : i32
    %c0_i32_0 = arith.constant 0 : i32
    return %arg1, %c0_i32 : i32, i32
  }
  func.func @transform_4(%arg0: i32, %arg1: i32) -> (i32, i32) {
    %c0_i32 = arith.constant 0 : i32
    %c0_i32_0 = arith.constant 0 : i32
    %c0_i32_1 = arith.constant 0 : i32
    return %c0_i32, %c0_i32_0 : i32, i32
  }
  func.func @transform_5(%arg0: i32, %arg1: i32) -> (i32, i32) {
    %c0_i32 = arith.constant 0 : i32
    %c0_i32_0 = arith.constant 0 : i32
    %c0_i32_1 = arith.constant 0 : i32
    return %c0_i32, %c0_i32_0 : i32, i32
  }
  func.func @transform_6(%arg0: i32, %arg1: i32) -> (i32, i32) {
    %c0_i32 = arith.constant 0 : i32
    %c0_i32_0 = arith.constant 0 : i32
    %c0_i32_1 = arith.constant 0 : i32
    return %c0_i32, %c0_i32_0 : i32, i32
  }
  func.func @transform_7(%arg0: i32, %arg1: i32) -> (i32, i32) {
    %c0_i32 = arith.constant 0 : i32
    %c0_i32_0 = arith.constant 0 : i32
    return %arg0, %c0_i32 : i32, i32
  }
}

module attributes {stable_mosaic.version = 11 : i64} {
  func.func @fused_attn_ln_kernel(%arg0: i32, %arg1: i32, %arg2: memref<1x16x32xf32, #tpu.memory_space<vmem>>, %arg3: memref<32x96xbf16, #tpu.memory_space<vmem>>, %arg4: memref<1x96xf32, #tpu.memory_space<vmem>>, %arg5: memref<32x32xbf16, #tpu.memory_space<vmem>>, %arg6: memref<1x32xf32, #tpu.memory_space<vmem>>, %arg7: memref<1x1x16xf32, #tpu.memory_space<vmem>>, %arg8: memref<1x32xf32, #tpu.memory_space<vmem>>, %arg9: memref<1x32xf32, #tpu.memory_space<vmem>>, %arg10: memref<1x16x32xf32, #tpu.memory_space<vmem>>, %arg11: memref<1x16x16xf32, #tpu.memory_space<vmem>>, %arg12: memref<16x96xbf16, #tpu.memory_space<vmem>>, %arg13: memref<16x32xbf16, #tpu.memory_space<vmem>>) attributes {dimension_semantics = [#tpu.dimension_semantics<parallel>, #tpu.dimension_semantics<arbitrary>], iteration_bounds = array<i64: 2, 1>, scalar_prefetch = 0 : i64, scratch_operands = 2 : i64, tpu.core_type = #tpu.core_type<tc>, window_params = [{transform_indices = @transform_0, window_bounds = array<i64: 1, 16, 32>}, {pipeline_mode = #tpu.pipeline_mode<synchronous>, transform_indices = @transform_1, window_bounds = array<i64: 32, 96>}, {pipeline_mode = #tpu.pipeline_mode<synchronous>, transform_indices = @transform_2, window_bounds = array<i64: 1, 96>}, {pipeline_mode = #tpu.pipeline_mode<synchronous>, transform_indices = @transform_3, window_bounds = array<i64: 32, 32>}, {pipeline_mode = #tpu.pipeline_mode<synchronous>, transform_indices = @transform_4, window_bounds = array<i64: 1, 32>}, {transform_indices = @transform_5, window_bounds = array<i64: 1, 1, 16>}, {pipeline_mode = #tpu.pipeline_mode<synchronous>, transform_indices = @transform_6, window_bounds = array<i64: 1, 32>}, {pipeline_mode = #tpu.pipeline_mode<synchronous>, transform_indices = @transform_7, window_bounds = array<i64: 1, 32>}, {transform_indices = @transform_8, window_bounds = array<i64: 1, 16, 32>}, {transform_indices = @transform_9, window_bounds = array<i64: 1, 16, 16>}]} {
    %c0_i32 = arith.constant 0 : i32
    %0 = arith.cmpi eq, %arg1, %c0_i32 : i32
    %1 = arith.extui %0 : i1 to i32
    %c0_i32_0 = arith.constant 0 : i32
    %2 = arith.cmpi ne, %1, %c0_i32_0 : i32
    scf.if %2 {
      %c0_81 = arith.constant 0 : index
      %c0_82 = arith.constant 0 : index
      %c0_83 = arith.constant 0 : index
      %148 = vector.load %arg2[%c0_81, %c0_82, %c0_83] : memref<1x16x32xf32, #tpu.memory_space<vmem>>, vector<1x16x32xf32>
      %149 = vector.shape_cast %148 : vector<1x16x32xf32> to vector<16x32xf32>
      %150 = arith.truncf %149 : vector<16x32xf32> to vector<16x32xbf16>
      %c0_84 = arith.constant 0 : index
      %c0_85 = arith.constant 0 : index
      %151 = vector.load %arg3[%c0_84, %c0_85] : memref<32x96xbf16, #tpu.memory_space<vmem>>, vector<32x96xbf16>
      %cst_86 = arith.constant dense<0.000000e+00> : vector<16x96xf32>
      %152 = tpu.matmul %150, %151, %cst_86 {dimension_numbers = #tpu.dot_dimension_numbers<[1], [0], [0], [1], [0, 0, 1, 1], [], []>} : vector<16x32xbf16>, vector<32x96xbf16>, vector<16x96xf32> -> vector<16x96xf32>
      %c0_87 = arith.constant 0 : index
      %c0_88 = arith.constant 0 : index
      %153 = vector.load %arg4[%c0_87, %c0_88] : memref<1x96xf32, #tpu.memory_space<vmem>>, vector<1x96xf32>
      %154 = vector.broadcast %153 : vector<1x96xf32> to vector<16x96xf32>
      %155 = arith.addf %152, %154 : vector<16x96xf32>
      %156 = arith.truncf %155 : vector<16x96xf32> to vector<16x96xbf16>
      %c0_89 = arith.constant 0 : index
      %c0_90 = arith.constant 0 : index
      %157 = vector.load %arg12[%c0_89, %c0_90] : memref<16x96xbf16, #tpu.memory_space<vmem>>, vector<16x96xbf16>
      tpu.vector_store %arg12[%c0_89, %c0_90], %156 {strides = array<i32>} : memref<16x96xbf16, #tpu.memory_space<vmem>>, vector<16x96xbf16>,
    } else {
    }
    %c16_i32 = arith.constant 16 : i32
    %3 = arith.muli %arg1, %c16_i32 : i32
    %4 = tpu.assume_multiple %3, 16 : i32
    %5 = arith.index_cast %4 : i32 to index
    %c0 = arith.constant 0 : index
    %6 = vector.load %arg12[%5, %c0] : memref<16x96xbf16, #tpu.memory_space<vmem>>, vector<16x32xbf16>
    %c0_1 = arith.constant 0 : index
    %c0_2 = arith.constant 0 : index
    %c0_3 = arith.constant 0 : index
    %7 = vector.load %arg7[%c0_1, %c0_2, %c0_3] : memref<1x1x16xf32, #tpu.memory_space<vmem>>, vector<1x1x16xf32>
    %8 = vector.shape_cast %7 : vector<1x1x16xf32> to vector<1x16xf32>
    %9 = vector.extract_strided_slice %6 {offsets = [0, 0], sizes = [16, 8], strides = [1, 1]} : vector<16x32xbf16> to vector<16x8xbf16>
    %c0_4 = arith.constant 0 : index
    %c32 = arith.constant 32 : index
    %10 = vector.load %arg12[%c0_4, %c32] : memref<16x96xbf16, #tpu.memory_space<vmem>>, vector<16x8xbf16>
    %c0_5 = arith.constant 0 : index
    %c64 = arith.constant 64 : index
    %11 = vector.load %arg12[%c0_5, %c64] : memref<16x96xbf16, #tpu.memory_space<vmem>>, vector<16x8xbf16>
    %cst = arith.constant dense<0.000000e+00> : vector<16x16xf32>
    %12 = tpu.matmul %9, %10, %cst {dimension_numbers = #tpu.dot_dimension_numbers<[1], [1], [0], [0], [0, 0, 1, 0], [], []>} : vector<16x8xbf16>, vector<16x8xbf16>, vector<16x16xf32> -> vector<16x16xf32>
    %13 = vector.broadcast %8 : vector<1x16xf32> to vector<16x16xf32>
    %14 = arith.addf %12, %13 : vector<16x16xf32>
    %cst_6 = arith.constant dense<0xFF800000> : vector<16xf32>
    %15 = vector.multi_reduction <maximumf>, %14, %cst_6 [1] : vector<16x16xf32> to vector<16xf32>
    %16 = vector.shape_cast %15 : vector<16xf32> to vector<16x1xf32>
    %17 = vector.broadcast %16 : vector<16x1xf32> to vector<16x16xf32>
    %18 = arith.subf %14, %17 : vector<16x16xf32>
    %19 = math.exp %18 : vector<16x16xf32>
    %cst_7 = arith.constant dense<0.000000e+00> : vector<16xf32>
    %20 = vector.multi_reduction <add>, %19, %cst_7 [1] : vector<16x16xf32> to vector<16xf32>
    %21 = vector.shape_cast %20 : vector<16xf32> to vector<16x1xf32>
    %22 = vector.broadcast %21 : vector<16x1xf32> to vector<16x16xf32>
    %23 = arith.divf %19, %22 : vector<16x16xf32>
    %c0_8 = arith.constant 0 : index
    %c0_9 = arith.constant 0 : index
    %c0_10 = arith.constant 0 : index
    %24 = vector.load %arg11[%c0_8, %c0_9, %c0_10] : memref<1x16x16xf32, #tpu.memory_space<vmem>>, vector<1x16x16xf32>
    %25 = vector.shape_cast %24 : vector<1x16x16xf32> to vector<16x16xf32>
    %26 = vector.shape_cast %23 : vector<16x16xf32> to vector<1x16x16xf32>
    tpu.vector_store %arg11[%c0_8, %c0_9, %c0_10], %26 {strides = array<i32>} : memref<1x16x16xf32, #tpu.memory_space<vmem>>, vector<1x16x16xf32>,
    %27 = arith.truncf %23 : vector<16x16xf32> to vector<16x16xbf16>
    %cst_11 = arith.constant dense<0.000000e+00> : vector<16x8xf32>
    %28 = tpu.matmul %27, %11, %cst_11 {dimension_numbers = #tpu.dot_dimension_numbers<[1], [0], [0], [1], [0, 0, 1, 1], [], []>} : vector<16x16xbf16>, vector<16x8xbf16>, vector<16x8xf32> -> vector<16x8xf32>
    %29 = arith.truncf %28 : vector<16x8xf32> to vector<16x8xbf16>
    %c0_12 = arith.constant 0 : index
    %c0_13 = arith.constant 0 : index
    %30 = vector.load %arg13[%c0_12, %c0_13] : memref<16x32xbf16, #tpu.memory_space<vmem>>, vector<16x8xbf16>
    tpu.vector_store %arg13[%c0_12, %c0_13], %29 {strides = array<i32>} : memref<16x32xbf16, #tpu.memory_space<vmem>>, vector<16x8xbf16>,
    %31 = vector.extract_strided_slice %6 {offsets = [0, 8], sizes = [16, 8], strides = [1, 1]} : vector<16x32xbf16> to vector<16x8xbf16>
    %c0_14 = arith.constant 0 : index
    %c40 = arith.constant 40 : index
    %32 = vector.load %arg12[%c0_14, %c40] : memref<16x96xbf16, #tpu.memory_space<vmem>>, vector<16x8xbf16>
    %c0_15 = arith.constant 0 : index
    %c72 = arith.constant 72 : index
    %33 = vector.load %arg12[%c0_15, %c72] : memref<16x96xbf16, #tpu.memory_space<vmem>>, vector<16x8xbf16>
    %cst_16 = arith.constant dense<0.000000e+00> : vector<16x16xf32>
    %34 = tpu.matmul %31, %32, %cst_16 {dimension_numbers = #tpu.dot_dimension_numbers<[1], [1], [0], [0], [0, 0, 1, 0], [], []>} : vector<16x8xbf16>, vector<16x8xbf16>, vector<16x16xf32> -> vector<16x16xf32>
    %35 = vector.broadcast %8 : vector<1x16xf32> to vector<16x16xf32>
    %36 = arith.addf %34, %35 : vector<16x16xf32>
    %cst_17 = arith.constant dense<0xFF800000> : vector<16xf32>
    %37 = vector.multi_reduction <maximumf>, %36, %cst_17 [1] : vector<16x16xf32> to vector<16xf32>
    %38 = vector.shape_cast %37 : vector<16xf32> to vector<16x1xf32>
    %39 = vector.broadcast %38 : vector<16x1xf32> to vector<16x16xf32>
    %40 = arith.subf %36, %39 : vector<16x16xf32>
    %41 = math.exp %40 : vector<16x16xf32>
    %cst_18 = arith.constant dense<0.000000e+00> : vector<16xf32>
    %42 = vector.multi_reduction <add>, %41, %cst_18 [1] : vector<16x16xf32> to vector<16xf32>
    %43 = vector.shape_cast %42 : vector<16xf32> to vector<16x1xf32>
    %44 = vector.broadcast %43 : vector<16x1xf32> to vector<16x16xf32>
    %45 = arith.divf %41, %44 : vector<16x16xf32>
    %c0_19 = arith.constant 0 : index
    %c0_20 = arith.constant 0 : index
    %c0_21 = arith.constant 0 : index
    %46 = vector.load %arg11[%c0_19, %c0_20, %c0_21] : memref<1x16x16xf32, #tpu.memory_space<vmem>>, vector<1x16x16xf32>
    %47 = vector.shape_cast %46 : vector<1x16x16xf32> to vector<16x16xf32>
    %48 = arith.addf %47, %45 : vector<16x16xf32>
    %c0_22 = arith.constant 0 : index
    %c0_23 = arith.constant 0 : index
    %c0_24 = arith.constant 0 : index
    %49 = vector.load %arg11[%c0_22, %c0_23, %c0_24] : memref<1x16x16xf32, #tpu.memory_space<vmem>>, vector<1x16x16xf32>
    %50 = vector.shape_cast %49 : vector<1x16x16xf32> to vector<16x16xf32>
    %51 = vector.shape_cast %48 : vector<16x16xf32> to vector<1x16x16xf32>
    tpu.vector_store %arg11[%c0_22, %c0_23, %c0_24], %51 {strides = array<i32>} : memref<1x16x16xf32, #tpu.memory_space<vmem>>, vector<1x16x16xf32>,
    %52 = arith.truncf %45 : vector<16x16xf32> to vector<16x16xbf16>
    %cst_25 = arith.constant dense<0.000000e+00> : vector<16x8xf32>
    %53 = tpu.matmul %52, %33, %cst_25 {dimension_numbers = #tpu.dot_dimension_numbers<[1], [0], [0], [1], [0, 0, 1, 1], [], []>} : vector<16x16xbf16>, vector<16x8xbf16>, vector<16x8xf32> -> vector<16x8xf32>
    %54 = arith.truncf %53 : vector<16x8xf32> to vector<16x8xbf16>
    %c0_26 = arith.constant 0 : index
    %c8 = arith.constant 8 : index
    %55 = vector.load %arg13[%c0_26, %c8] : memref<16x32xbf16, #tpu.memory_space<vmem>>, vector<16x8xbf16>
    tpu.vector_store %arg13[%c0_26, %c8], %54 {strides = array<i32>} : memref<16x32xbf16, #tpu.memory_space<vmem>>, vector<16x8xbf16>,
    %56 = vector.extract_strided_slice %6 {offsets = [0, 16], sizes = [16, 8], strides = [1, 1]} : vector<16x32xbf16> to vector<16x8xbf16>
    %c0_27 = arith.constant 0 : index
    %c48 = arith.constant 48 : index
    %57 = vector.load %arg12[%c0_27, %c48] : memref<16x96xbf16, #tpu.memory_space<vmem>>, vector<16x8xbf16>
    %c0_28 = arith.constant 0 : index
    %c80 = arith.constant 80 : index
    %58 = vector.load %arg12[%c0_28, %c80] : memref<16x96xbf16, #tpu.memory_space<vmem>>, vector<16x8xbf16>
    %cst_29 = arith.constant dense<0.000000e+00> : vector<16x16xf32>
    %59 = tpu.matmul %56, %57, %cst_29 {dimension_numbers = #tpu.dot_dimension_numbers<[1], [1], [0], [0], [0, 0, 1, 0], [], []>} : vector<16x8xbf16>, vector<16x8xbf16>, vector<16x16xf32> -> vector<16x16xf32>
    %60 = vector.broadcast %8 : vector<1x16xf32> to vector<16x16xf32>
    %61 = arith.addf %59, %60 : vector<16x16xf32>
    %cst_30 = arith.constant dense<0xFF800000> : vector<16xf32>
    %62 = vector.multi_reduction <maximumf>, %61, %cst_30 [1] : vector<16x16xf32> to vector<16xf32>
    %63 = vector.shape_cast %62 : vector<16xf32> to vector<16x1xf32>
    %64 = vector.broadcast %63 : vector<16x1xf32> to vector<16x16xf32>
    %65 = arith.subf %61, %64 : vector<16x16xf32>
    %66 = math.exp %65 : vector<16x16xf32>
    %cst_31 = arith.constant dense<0.000000e+00> : vector<16xf32>
    %67 = vector.multi_reduction <add>, %66, %cst_31 [1] : vector<16x16xf32> to vector<16xf32>
    %68 = vector.shape_cast %67 : vector<16xf32> to vector<16x1xf32>
    %69 = vector.broadcast %68 : vector<16x1xf32> to vector<16x16xf32>
    %70 = arith.divf %66, %69 : vector<16x16xf32>
    %c0_32 = arith.constant 0 : index
    %c0_33 = arith.constant 0 : index
    %c0_34 = arith.constant 0 : index
    %71 = vector.load %arg11[%c0_32, %c0_33, %c0_34] : memref<1x16x16xf32, #tpu.memory_space<vmem>>, vector<1x16x16xf32>
    %72 = vector.shape_cast %71 : vector<1x16x16xf32> to vector<16x16xf32>
    %73 = arith.addf %72, %70 : vector<16x16xf32>
    %c0_35 = arith.constant 0 : index
    %c0_36 = arith.constant 0 : index
    %c0_37 = arith.constant 0 : index
    %74 = vector.load %arg11[%c0_35, %c0_36, %c0_37] : memref<1x16x16xf32, #tpu.memory_space<vmem>>, vector<1x16x16xf32>
    %75 = vector.shape_cast %74 : vector<1x16x16xf32> to vector<16x16xf32>
    %76 = vector.shape_cast %73 : vector<16x16xf32> to vector<1x16x16xf32>
    tpu.vector_store %arg11[%c0_35, %c0_36, %c0_37], %76 {strides = array<i32>} : memref<1x16x16xf32, #tpu.memory_space<vmem>>, vector<1x16x16xf32>,
    %77 = arith.truncf %70 : vector<16x16xf32> to vector<16x16xbf16>
    %cst_38 = arith.constant dense<0.000000e+00> : vector<16x8xf32>
    %78 = tpu.matmul %77, %58, %cst_38 {dimension_numbers = #tpu.dot_dimension_numbers<[1], [0], [0], [1], [0, 0, 1, 1], [], []>} : vector<16x16xbf16>, vector<16x8xbf16>, vector<16x8xf32> -> vector<16x8xf32>
    %79 = arith.truncf %78 : vector<16x8xf32> to vector<16x8xbf16>
    %c0_39 = arith.constant 0 : index
    %c16 = arith.constant 16 : index
    %80 = vector.load %arg13[%c0_39, %c16] : memref<16x32xbf16, #tpu.memory_space<vmem>>, vector<16x8xbf16>
    tpu.vector_store %arg13[%c0_39, %c16], %79 {strides = array<i32>} : memref<16x32xbf16, #tpu.memory_space<vmem>>, vector<16x8xbf16>,
    %81 = vector.extract_strided_slice %6 {offsets = [0, 24], sizes = [16, 8], strides = [1, 1]} : vector<16x32xbf16> to vector<16x8xbf16>
    %c0_40 = arith.constant 0 : index
    %c56 = arith.constant 56 : index
    %82 = vector.load %arg12[%c0_40, %c56] : memref<16x96xbf16, #tpu.memory_space<vmem>>, vector<16x8xbf16>
    %c0_41 = arith.constant 0 : index
    %c88 = arith.constant 88 : index
    %83 = vector.load %arg12[%c0_41, %c88] : memref<16x96xbf16, #tpu.memory_space<vmem>>, vector<16x8xbf16>
    %cst_42 = arith.constant dense<0.000000e+00> : vector<16x16xf32>
    %84 = tpu.matmul %81, %82, %cst_42 {dimension_numbers = #tpu.dot_dimension_numbers<[1], [1], [0], [0], [0, 0, 1, 0], [], []>} : vector<16x8xbf16>, vector<16x8xbf16>, vector<16x16xf32> -> vector<16x16xf32>
    %85 = vector.broadcast %8 : vector<1x16xf32> to vector<16x16xf32>
    %86 = arith.addf %84, %85 : vector<16x16xf32>
    %cst_43 = arith.constant dense<0xFF800000> : vector<16xf32>
    %87 = vector.multi_reduction <maximumf>, %86, %cst_43 [1] : vector<16x16xf32> to vector<16xf32>
    %88 = vector.shape_cast %87 : vector<16xf32> to vector<16x1xf32>
    %89 = vector.broadcast %88 : vector<16x1xf32> to vector<16x16xf32>
    %90 = arith.subf %86, %89 : vector<16x16xf32>
    %91 = math.exp %90 : vector<16x16xf32>
    %cst_44 = arith.constant dense<0.000000e+00> : vector<16xf32>
    %92 = vector.multi_reduction <add>, %91, %cst_44 [1] : vector<16x16xf32> to vector<16xf32>
    %93 = vector.shape_cast %92 : vector<16xf32> to vector<16x1xf32>
    %94 = vector.broadcast %93 : vector<16x1xf32> to vector<16x16xf32>
    %95 = arith.divf %91, %94 : vector<16x16xf32>
    %c0_45 = arith.constant 0 : index
    %c0_46 = arith.constant 0 : index
    %c0_47 = arith.constant 0 : index
    %96 = vector.load %arg11[%c0_45, %c0_46, %c0_47] : memref<1x16x16xf32, #tpu.memory_space<vmem>>, vector<1x16x16xf32>
    %97 = vector.shape_cast %96 : vector<1x16x16xf32> to vector<16x16xf32>
    %98 = arith.addf %97, %95 : vector<16x16xf32>
    %c0_48 = arith.constant 0 : index
    %c0_49 = arith.constant 0 : index
    %c0_50 = arith.constant 0 : index
    %99 = vector.load %arg11[%c0_48, %c0_49, %c0_50] : memref<1x16x16xf32, #tpu.memory_space<vmem>>, vector<1x16x16xf32>
    %100 = vector.shape_cast %99 : vector<1x16x16xf32> to vector<16x16xf32>
    %101 = vector.shape_cast %98 : vector<16x16xf32> to vector<1x16x16xf32>
    tpu.vector_store %arg11[%c0_48, %c0_49, %c0_50], %101 {strides = array<i32>} : memref<1x16x16xf32, #tpu.memory_space<vmem>>, vector<1x16x16xf32>,
    %102 = arith.truncf %95 : vector<16x16xf32> to vector<16x16xbf16>
    %cst_51 = arith.constant dense<0.000000e+00> : vector<16x8xf32>
    %103 = tpu.matmul %102, %83, %cst_51 {dimension_numbers = #tpu.dot_dimension_numbers<[1], [0], [0], [1], [0, 0, 1, 1], [], []>} : vector<16x16xbf16>, vector<16x8xbf16>, vector<16x8xf32> -> vector<16x8xf32>
    %104 = arith.truncf %103 : vector<16x8xf32> to vector<16x8xbf16>
    %c0_52 = arith.constant 0 : index
    %c24 = arith.constant 24 : index
    %105 = vector.load %arg13[%c0_52, %c24] : memref<16x32xbf16, #tpu.memory_space<vmem>>, vector<16x8xbf16>
    tpu.vector_store %arg13[%c0_52, %c24], %104 {strides = array<i32>} : memref<16x32xbf16, #tpu.memory_space<vmem>>, vector<16x8xbf16>,
    %c0_53 = arith.constant 0 : index
    %c0_54 = arith.constant 0 : index
    %c0_55 = arith.constant 0 : index
    %106 = vector.load %arg11[%c0_53, %c0_54, %c0_55] : memref<1x16x16xf32, #tpu.memory_space<vmem>>, vector<1x16x16xf32>
    %107 = vector.shape_cast %106 : vector<1x16x16xf32> to vector<16x16xf32>
    %cst_56 = arith.constant 2.500000e-01 : f32
    %108 = vector.broadcast %cst_56 : f32 to vector<16x16xf32>
    %109 = arith.mulf %107, %108 : vector<16x16xf32>
    %c0_57 = arith.constant 0 : index
    %c0_58 = arith.constant 0 : index
    %c0_59 = arith.constant 0 : index
    %110 = vector.load %arg11[%c0_57, %c0_58, %c0_59] : memref<1x16x16xf32, #tpu.memory_space<vmem>>, vector<1x16x16xf32>
    %111 = vector.shape_cast %110 : vector<1x16x16xf32> to vector<16x16xf32>
    %112 = vector.shape_cast %109 : vector<16x16xf32> to vector<1x16x16xf32>
    tpu.vector_store %arg11[%c0_57, %c0_58, %c0_59], %112 {strides = array<i32>} : memref<1x16x16xf32, #tpu.memory_space<vmem>>, vector<1x16x16xf32>,
    %c0_60 = arith.constant 0 : index
    %c0_61 = arith.constant 0 : index
    %113 = vector.load %arg13[%c0_60, %c0_61] : memref<16x32xbf16, #tpu.memory_space<vmem>>, vector<16x32xbf16>
    %c0_62 = arith.constant 0 : index
    %c0_63 = arith.constant 0 : index
    %114 = vector.load %arg5[%c0_62, %c0_63] : memref<32x32xbf16, #tpu.memory_space<vmem>>, vector<32x32xbf16>
    %cst_64 = arith.constant dense<0.000000e+00> : vector<16x32xf32>
    %115 = tpu.matmul %113, %114, %cst_64 {dimension_numbers = #tpu.dot_dimension_numbers<[1], [0], [0], [1], [0, 0, 1, 1], [], []>} : vector<16x32xbf16>, vector<32x32xbf16>, vector<16x32xf32> -> vector<16x32xf32>
    %c0_65 = arith.constant 0 : index
    %c0_66 = arith.constant 0 : index
    %116 = vector.load %arg6[%c0_65, %c0_66] : memref<1x32xf32, #tpu.memory_space<vmem>>, vector<1x32xf32>
    %117 = vector.broadcast %116 : vector<1x32xf32> to vector<16x32xf32>
    %118 = arith.addf %115, %117 : vector<16x32xf32>
    %c0_67 = arith.constant 0 : index
    %119 = arith.index_cast %4 : i32 to index
    %c0_68 = arith.constant 0 : index
    %120 = vector.load %arg2[%c0_67, %119, %c0_68] : memref<1x16x32xf32, #tpu.memory_space<vmem>>, vector<1x16x32xf32>
    %121 = vector.shape_cast %120 : vector<1x16x32xf32> to vector<16x32xf32>
    %122 = arith.addf %121, %118 : vector<16x32xf32>
    %cst_69 = arith.constant dense<0.000000e+00> : vector<16xf32>
    %123 = vector.multi_reduction <add>, %122, %cst_69 [1] : vector<16x32xf32> to vector<16xf32>
    %124 = vector.shape_cast %123 : vector<16xf32> to vector<16x1xf32>
    %cst_70 = arith.constant 3.200000e+01 : f32
    %125 = vector.broadcast %cst_70 : f32 to vector<16x1xf32>
    %126 = arith.divf %124, %125 : vector<16x1xf32>
    %127 = vector.broadcast %126 : vector<16x1xf32> to vector<16x32xf32>
    %128 = arith.subf %122, %127 : vector<16x32xf32>
    %129 = arith.mulf %128, %128 : vector<16x32xf32>
    %cst_71 = arith.constant dense<0.000000e+00> : vector<16xf32>
    %130 = vector.multi_reduction <add>, %129, %cst_71 [1] : vector<16x32xf32> to vector<16xf32>
    %131 = vector.shape_cast %130 : vector<16xf32> to vector<16x1xf32>
    %cst_72 = arith.constant 3.200000e+01 : f32
    %132 = vector.broadcast %cst_72 : f32 to vector<16x1xf32>
    %133 = arith.divf %131, %132 : vector<16x1xf32>
    %cst_73 = arith.constant 9.99999974E-6 : f32
    %134 = vector.broadcast %cst_73 : f32 to vector<16x1xf32>
    %135 = arith.addf %133, %134 : vector<16x1xf32>
    %136 = math.rsqrt %135 : vector<16x1xf32>
    %137 = vector.broadcast %136 : vector<16x1xf32> to vector<16x32xf32>
    %138 = arith.mulf %128, %137 : vector<16x32xf32>
    %c0_74 = arith.constant 0 : index
    %c0_75 = arith.constant 0 : index
    %139 = vector.load %arg8[%c0_74, %c0_75] : memref<1x32xf32, #tpu.memory_space<vmem>>, vector<1x32xf32>
    %140 = vector.broadcast %139 : vector<1x32xf32> to vector<16x32xf32>
    %141 = arith.mulf %138, %140 : vector<16x32xf32>
    %c0_76 = arith.constant 0 : index
    %c0_77 = arith.constant 0 : index
    %142 = vector.load %arg9[%c0_76, %c0_77] : memref<1x32xf32, #tpu.memory_space<vmem>>, vector<1x32xf32>
    %143 = vector.broadcast %142 : vector<1x32xf32> to vector<16x32xf32>
    %144 = arith.addf %141, %143 : vector<16x32xf32>
    %c0_78 = arith.constant 0 : index
    %c0_79 = arith.constant 0 : index
    %c0_80 = arith.constant 0 : index
    %145 = vector.load %arg10[%c0_78, %c0_79, %c0_80] : memref<1x16x32xf32, #tpu.memory_space<vmem>>, vector<1x16x32xf32>
    %146 = vector.shape_cast %145 : vector<1x16x32xf32> to vector<16x32xf32>
    %147 = vector.shape_cast %144 : vector<16x32xf32> to vector<1x16x32xf32>
    tpu.vector_store %arg10[%c0_78, %c0_79, %c0_80], %147 {strides = array<i32>} : memref<1x16x32xf32, #tpu.memory_space<vmem>>, vector<1x16x32xf32>,
    return
  }
  func.func @transform_0(%arg0: i32, %arg1: i32) -> (i32, i32, i32) {
    %c0_i32 = arith.constant 0 : i32
    %c0_i32_0 = arith.constant 0 : i32
    %c0_i32_1 = arith.constant 0 : i32
    return %arg0, %c0_i32, %c0_i32_0 : i32, i32, i32
  }
  func.func @transform_1(%arg0: i32, %arg1: i32) -> (i32, i32) {
    %c0_i32 = arith.constant 0 : i32
    %c0_i32_0 = arith.constant 0 : i32
    %c0_i32_1 = arith.constant 0 : i32
    return %c0_i32, %c0_i32_0 : i32, i32
  }
  func.func @transform_2(%arg0: i32, %arg1: i32) -> (i32, i32) {
    %c0_i32 = arith.constant 0 : i32
    %c0_i32_0 = arith.constant 0 : i32
    %c0_i32_1 = arith.constant 0 : i32
    return %c0_i32, %c0_i32_0 : i32, i32
  }
  func.func @transform_3(%arg0: i32, %arg1: i32) -> (i32, i32) {
    %c0_i32 = arith.constant 0 : i32
    %c0_i32_0 = arith.constant 0 : i32
    %c0_i32_1 = arith.constant 0 : i32
    return %c0_i32, %c0_i32_0 : i32, i32
  }
  func.func @transform_4(%arg0: i32, %arg1: i32) -> (i32, i32) {
    %c0_i32 = arith.constant 0 : i32
    %c0_i32_0 = arith.constant 0 : i32
    %c0_i32_1 = arith.constant 0 : i32
    return %c0_i32, %c0_i32_0 : i32, i32
  }
  func.func @transform_5(%arg0: i32, %arg1: i32) -> (i32, i32, i32) {
    %c0_i32 = arith.constant 0 : i32
    %c0_i32_0 = arith.constant 0 : i32
    %c0_i32_1 = arith.constant 0 : i32
    return %arg0, %c0_i32, %c0_i32_0 : i32, i32, i32
  }
  func.func @transform_6(%arg0: i32, %arg1: i32) -> (i32, i32) {
    %c0_i32 = arith.constant 0 : i32
    %c0_i32_0 = arith.constant 0 : i32
    %c0_i32_1 = arith.constant 0 : i32
    return %c0_i32, %c0_i32_0 : i32, i32
  }
  func.func @transform_7(%arg0: i32, %arg1: i32) -> (i32, i32) {
    %c0_i32 = arith.constant 0 : i32
    %c0_i32_0 = arith.constant 0 : i32
    %c0_i32_1 = arith.constant 0 : i32
    return %c0_i32, %c0_i32_0 : i32, i32
  }
  func.func @transform_8(%arg0: i32, %arg1: i32) -> (i32, i32, i32) {
    %c0_i32 = arith.constant 0 : i32
    %c0_i32_0 = arith.constant 0 : i32
    return %arg0, %arg1, %c0_i32 : i32, i32, i32
  }
  func.func @transform_9(%arg0: i32, %arg1: i32) -> (i32, i32, i32) {
    %c0_i32 = arith.constant 0 : i32
    %c0_i32_0 = arith.constant 0 : i32
    return %arg0, %arg1, %c0_i32 : i32, i32, i32
  }
}

</mosaic_0001>

<bundles_post_ra>
// kernel: mul.9
= control target key start
LH: loop header
LB: loop body
LE: loop exit
PB: predicated region body
PF: predicated region fallthrough
CT: control target
= control target key end

     0   :  { %s34_s0 = inlined_call_operand.vmem [shape: f32[1,96], index: 0, kind: input, shape index: {}]   ;;  %s35_s1 = inlined_call_operand.vmem [shape: f32[1,96], index: 1, kind: input, shape index: {}]   ;;  %s36_s2 = inlined_call_operand.vmem [shape: f32[1,96], index: 2, kind: output, shape index: {}]  }
   0x1   :  { %v3_v0 = vld [vmem:[%s34_s0] sm:$0x1] }
   0x2   :  { %v4_v1 = vld [vmem:[%s35_s1] sm:$0x1] }
   0x3   :  { %v7_v2 = vmul.f32 %v4_v1, %v3_v0 }
   0x5   :  { %9 = vst [vmem:[%s36_s2] sm:$0x1] %v7_v2 }

// kernel: nstack_merge_encoder_layer.3
= control target key start
LH: loop header
LB: loop body
LE: loop exit
PB: predicated region body
PF: predicated region fallthrough
CT: control target
= control target key end

     0   :  { %vm31_vm0 = vcmask 261120   ;;  %v362_v12 = vmov 0.0   ;;  %vm130_vm1 = vcmask 523264   ;;  %v363_v57 = vmov 32.0   ;;  %s507_s1 = inlined_call_operand.vmem [shape: bf16[32,64], index: 1, kind: input, shape index: {}]   ;;  %s508_s0 = inlined_call_operand.vmem [shape: f32[32,32], index: 0, kind: input, shape index: {}]   ;;  %s509_s2 = inlined_call_operand.vmem [shape: f32[1,64], index: 2, kind: input, shape index: {}]   ;;  %s510_s3 = inlined_call_operand.vmem [shape: bf16[64,32], index: 3, kind: input, shape index: {}]   ;;  %s511_s4 = inlined_call_operand.vmem [shape: f32[1,32], index: 4, kind: input, shape index: {}]   ;;  %s512_s5 = inlined_call_operand.vmem [shape: f32[1,32], index: 5, kind: input, shape index: {}]   ;;  %s513_s6 = inlined_call_operand.vmem [shape: f32[1,32], index: 6, kind: input, shape index: {}]   ;;  %s514_s7 = inlined_call_operand.vmem [shape: f32[32,32], index: 7, kind: output, shape index: {}]  }
   0x1   :  { %v335_v0 = vld [vmem:[%s507_s1 + $0x8] sm:$0xff]  ;;  %v334_v1 = vld [vmem:[%s507_s1] sm:$0xff]  ;;  %v421_v4 = vld [vmem:[%s508_s0 + $0x10] sm:$0xff]  ;;  %32 = vst.msk [vmem:[#allocation2] sm:$0xff] %vm31_vm0, %v362_v12  ;;  %352 = vrcp.f32 %v363_v57 }
   0x2   :  { %v36_v2 = vld [vmem:[%s508_s0] sm:$0xff]  ;;  %v416_v3 = vld [vmem:[%s508_s0 + $0x8] sm:$0xff]  ;;  %75 = vmatpush.bf16.msra.mxu0 %v335_v0  ;;  %340 = vmatpush.bf16.msra.mxu3 %v335_v0  ;;  %v426_v5 = vld [vmem:[%s508_s0 + $0x18] sm:$0xff]  ;;  %33 = vst.msk [vmem:[#allocation2 + $0x8] sm:$0xff] %vm31_vm0, %v362_v12 }
   0x3   :  { %v40_v6 = vpack.c.bf16 %v416_v3, %v36_v2  ;;  %v41_v7 = vpack.c.bf16 %v426_v5, %v421_v4  ;;  %v339_v8 = vld [vmem:[%s510_s3 + $0x18] sm:$0xff]  ;;  %v338_v9 = vld [vmem:[%s510_s3 + $0x10] sm:$0xff]  ;;  %v337_v10 = vld [vmem:[%s510_s3 + $0x8] sm:$0xff]  ;;  %34 = vst.msk [vmem:[#allocation2 + $0x10] sm:$0xff] %vm31_vm0, %v362_v12 }
   0x4   :  { %141 = vmatpush.bf16.msra.mxu1 %v339_v8  ;;  %342 = vmatpush.bf16.msra.mxu2 %v339_v8  ;;  %v336_v11 = vld [vmem:[%s510_s3] sm:$0xff]  ;;  %35 = vst.msk [vmem:[#allocation2 + $0x18] sm:$0xff] %vm31_vm0, %v362_v12 }
   0x5   :  { %v348_v14 = vld [vmem:[%s509_s2] ss:$0 sm:$0xff] }
   0x6   :  { %76 = vmatpush.bf16.msra.mxu0 %v334_v1  ;;  %341 = vmatpush.bf16.msra.mxu3 %v334_v1  ;;  %v349_v34 = vld [vmem:[%s511_s4] ss:$0 sm:$0xff] }
   0x7   :  { %v353_v58 = vpop.eup %352 }
   0x8   :  { %142 = vmatpush.bf16.msra.mxu1 %v338_v9  ;;  %343 = vmatpush.bf16.msra.mxu2 %v338_v9  ;;  %v94_v28 = vld [vmem:[#allocation2] sm:$0xff]  ;;  %v200_v59 = vmul.f32 32.0, %v353_v58  ;;  %vm204_vm2 = vweird.f32 %v353_v58 }
   0x9   :  { %314 = vmatmul.msk.bf16.vlgmr.msra.gmra.mxu0 %vm31_vm0, %v40_v6  ;;  %315 = vmatmul.msk.bf16.vlgmr.msra.gmra.mxu3 %vm31_vm0, %v41_v7  ;;  %v95_v31 = vld [vmem:[#allocation2 + $0x8] sm:$0xff] }
   0xa   :  { %v96_v35 = vld [vmem:[#allocation2 + $0x10] sm:$0xff]  ;;  %v201_v60 = vsub.f32 1.0, %v200_v59 }
   0xb   :  { %v97_v42 = vld [vmem:[#allocation2 + $0x18] sm:$0xff] }
   0xc   :  { %143 = vmatpush.bf16.msra.mxu1 %v337_v10  ;;  %344 = vmatpush.bf16.msra.mxu2 %v337_v10  ;;  %v202_v61 = vmul.f32 %v353_v58, %v201_v60 }
   0xe   :  { %v203_v62 = vadd.f32 %v353_v58, %v202_v61 }
  0x10   :  { %144 = vmatpush.bf16.msra.mxu1 %v336_v11  ;;  %345 = vmatpush.bf16.msra.mxu2 %v336_v11  ;;  %v205_v63 = vsel %vm204_vm2, %v353_v58, %v203_v62 }
  0x86   :  { %v78_v13 = vpop.f32.mrf.mxu0 }
  0x87   :  { %v79_v15 = vadd.f32 %v348_v14, %v78_v13 }
  0x89   :  { %v88_v18 = vmax.f32 %v79_v15, 0.0 }
  0x8c   :  { %v83_v16 = vpop.f32.mrf.mxu3 }
  0x8d   :  { %v84_v21 = vadd.f32 %v348_v14, %v83_v16 }
  0x8e   :  { %v80_v17 = vpop.f32.mrf.mxu0 }
  0x8f   :  { %v81_v19 = vadd.f32 %v348_v14, %v80_v17  ;;  %v90_v25 = vmax.f32 %v84_v21, 0.0 }
  0x91   :  { %v89_v20 = vmax.f32 %v81_v19, 0.0 }
  0x93   :  { %v92_v22 = vpack.c.bf16 %v89_v20, %v88_v18 }
  0x94   :  { %v85_v23 = vpop.f32.mrf.mxu3 }
  0x95   :  { %v86_v24 = vadd.f32 %v348_v14, %v85_v23  ;;  %332 = vmatmul.msk.bf16.vlgmr.msra.gmra.mxu1 %vm130_vm1, %v92_v22 }
  0x97   :  { %v91_v26 = vmax.f32 %v86_v24, 0.0 }
  0x99   :  { %v93_v27 = vpack.c.bf16 %v91_v26, %v90_v25 }
  0x9b   :  { %333 = vmatmul.msk.bf16.vlgmr.msra.gmra.mxu2 %vm130_vm1, %v93_v27 }
 0x112   :  { %v146_v29 = vpop.f32.mrf.mxu1 }
 0x113   :  { %v156_v30 = vadd.f32 %v146_v29, %v94_v28 }
 0x115   :  { %160 = vst.msk [vmem:[#allocation2] sm:$0xff] %vm31_vm0, %v156_v30 }
 0x11a   :  { %v148_v32 = vpop.f32.mrf.mxu1 }
 0x11b   :  { %v157_v33 = vadd.f32 %v148_v32, %v95_v31 }
 0x11c   :  { %v171_v36 = vld [vmem:[#allocation2] sm:$0xff] }
 0x11d   :  { %161 = vst.msk [vmem:[#allocation2 + $0x8] sm:$0xff] %vm31_vm0, %v157_v33  ;;  %v175_v37 = vadd.f32 %v171_v36, %v36_v2 }
 0x11e   :  { %v151_v38 = vpop.f32.mrf.mxu2 }
 0x11f   :  { %v158_v39 = vadd.f32 %v151_v38, %v96_v35  ;;  %v183_v40 = vadd.f32 %v349_v34, %v175_v37  ;;  %v350_v38 = vld [vmem:[%s512_s5] ss:$0 sm:$0xff] }
 0x121   :  { %162 = vst.msk [vmem:[#allocation2 + $0x10] sm:$0xff] %vm31_vm0, %v158_v39  ;;  %v187_v41 = vsel %vm31_vm0, %v183_v40, 0.0 }
 0x122   :  { %188 = vadd.xlane.f32.xlu0 %v187_v41 }
 0x124   :  { %v172_v43 = vld [vmem:[#allocation2 + $0x8] sm:$0xff] }
 0x125   :  { %v176_v44 = vadd.f32 %v172_v43, %v416_v3  ;;  %v351_v43 = vld [vmem:[%s513_s6] ss:$0 sm:$0xff] }
 0x126   :  { %v153_v45 = vpop.f32.mrf.mxu2 }
 0x127   :  { %v159_v46 = vadd.f32 %v153_v45, %v97_v42  ;;  %v184_v47 = vadd.f32 %v349_v34, %v176_v44 }
 0x128   :  { %v173_v48 = vld [vmem:[#allocation2 + $0x10] sm:$0xff] }
 0x129   :  { %163 = vst.msk [vmem:[#allocation2 + $0x18] sm:$0xff] %vm31_vm0, %v159_v46  ;;  %v190_v49 = vsel %vm31_vm0, %v184_v47, 0.0  ;;  %v177_v50 = vadd.f32 %v173_v48, %v421_v4 }
 0x12a   :  { %191 = vadd.xlane.f32.xlu0 %v190_v49 }
 0x12b   :  { %v185_v51 = vadd.f32 %v349_v34, %v177_v50 }
 0x12d   :  { %v193_v52 = vsel %vm31_vm0, %v185_v51, 0.0 }
 0x12e   :  { %194 = vadd.xlane.f32.xlu1 %v193_v52 }
 0x130   :  { %v174_v53 = vld [vmem:[#allocation2 + $0x18] sm:$0xff] }
 0x131   :  { %v178_v54 = vadd.f32 %v174_v53, %v426_v5 }
 0x133   :  { %v186_v55 = vadd.f32 %v349_v34, %v178_v54 }
 0x135   :  { %v196_v56 = vsel %vm31_vm0, %v186_v55, 0.0 }
 0x136   :  { %197 = vadd.xlane.f32.xlu1 %v196_v56 }
 0x195   :  { %v189_v0 = vpop.xlane.xlu0 %188 }
 0x196   :  { %v206_v1 = vmul.f32 %v205_v63, %v189_v0 }
 0x198   :  { %v210_v2 = vsub.f32 %v183_v40, %v206_v1 }
 0x19a   :  { %v214_v3 = vmul.f32 %v210_v2, %v210_v2 }
 0x19c   :  { %v218_v4 = vsel %vm31_vm0, %v214_v3, 0.0 }
 0x19d   :  { %219 = vadd.xlane.f32.xlu2 %v218_v4  ;;  %v192_v5 = vpop.xlane.xlu0 %191 }
 0x19e   :  { %v207_v6 = vmul.f32 %v205_v63, %v192_v5 }
 0x1a0   :  { %v467_v7 = vsub.f32 %v184_v47, %v207_v6 }
 0x1a1   :  { %v195_v8 = vpop.xlane.xlu1 %194 }
 0x1a2   :  { %v208_v9 = vmul.f32 %v205_v63, %v195_v8  ;;  %v215_v10 = vmul.f32 %v467_v7, %v467_v7 }
 0x1a4   :  { %v471_v11 = vsub.f32 %v185_v51, %v208_v9  ;;  %v221_v12 = vsel %vm31_vm0, %v215_v10, 0.0 }
 0x1a5   :  { %222 = vadd.xlane.f32.xlu2 %v221_v12 }
 0x1a6   :  { %v216_v13 = vmul.f32 %v471_v11, %v471_v11 }
 0x1a8   :  { %v224_v14 = vsel %vm31_vm0, %v216_v13, 0.0 }
 0x1a9   :  { %v198_v15 = vpop.xlane.xlu1 %197  ;;  %225 = vadd.xlane.f32.xlu0 %v224_v14 }
 0x1aa   :  { %v209_v16 = vmul.f32 %v205_v63, %v198_v15 }
 0x1ac   :  { %v477_v17 = vsub.f32 %v186_v55, %v209_v16 }
 0x1ae   :  { %v217_v18 = vmul.f32 %v477_v17, %v477_v17 }
 0x1b0   :  { %v227_v19 = vsel %vm31_vm0, %v217_v18, 0.0 }
 0x1b1   :  { %228 = vadd.xlane.f32.xlu1 %v227_v19 }
 0x210   :  { %v220_v20 = vpop.xlane.xlu2 %219 }
 0x211   :  { %v230_v21 = vmul.f32 %v220_v20, %v205_v63 }
 0x213   :  { %v234_v22 = vadd.f32 1e-05, %v230_v21 }
 0x215   :  { %354 = vrsqrt.f32 %v234_v22  ;;  %vm244_vm4 = vweird.f32 %v234_v22 }
 0x218   :  { %v223_v23 = vpop.xlane.xlu2 %222 }
 0x219   :  { %v231_v24 = vmul.f32 %v223_v23, %v205_v63 }
 0x21b   :  { %v355_v25 = vpop.eup %354  ;;  %v235_v26 = vadd.f32 1e-05, %v231_v24 }
 0x21c   :  { %v239_v27 = vmul.f32 %v355_v25, %v234_v22  ;;  %v226_v28 = vpop.xlane.xlu0 %225  ;;  %vm245_vm3 = vweird.f32 %v355_v25 }
 0x21d   :  { %356 = vrsqrt.f32 %v235_v26  ;;  %v232_v29 = vmul.f32 %v226_v28, %v205_v63  ;;  %vm246_vm5 = vmor %vm244_vm4, %vm245_vm3  ;;  %vm254_vm7 = vweird.f32 %v235_v26 }
 0x21e   :  { %v240_v30 = vmul.f32 %v355_v25, %v239_v27 }
 0x21f   :  { %v236_v31 = vadd.f32 1e-05, %v232_v29 }
 0x220   :  { %v241_v32 = vmul.f32 0.5, %v240_v30 }
 0x221   :  { %358 = vrsqrt.f32 %v236_v31  ;;  %vm264_vm10 = vweird.f32 %v236_v31 }
 0x222   :  { %v242_v33 = vsub.f32 1.5, %v241_v32 }
 0x223   :  { %v357_v34 = vpop.eup %356 }
 0x224   :  { %v243_v35 = vmul.f32 %v355_v25, %v242_v33  ;;  %v249_v36 = vmul.f32 %v357_v34, %v235_v26  ;;  %v229_v37 = vpop.xlane.xlu1 %228  ;;  %vm255_vm6 = vweird.f32 %v357_v34 }
 0x225   :  { %v233_v39 = vmul.f32 %v229_v37, %v205_v63  ;;  %vm256_vm8 = vmor %vm254_vm7, %vm255_vm6 }
 0x226   :  { %v247_v40 = vsel %vm246_vm5, %v355_v25, %v243_v35  ;;  %v250_v41 = vmul.f32 %v357_v34, %v249_v36 }
 0x227   :  { %v359_v42 = vpop.eup %358  ;;  %v278_v44 = vmul.f32 %v247_v40, %v210_v2  ;;  %v237_v45 = vadd.f32 1e-05, %v233_v39 }
 0x228   :  { %v251_v46 = vmul.f32 0.5, %v250_v41  ;;  %v259_v47 = vmul.f32 %v359_v42, %v236_v31  ;;  %vm265_vm9 = vweird.f32 %v359_v42 }
 0x229   :  { %v286_v48 = vmul.f32 %v350_v38, %v278_v44  ;;  %360 = vrsqrt.f32 %v237_v45  ;;  %vm266_vm11 = vmor %vm264_vm10, %vm265_vm9  ;;  %vm274_vm13 = vweird.f32 %v237_v45 }
 0x22a   :  { %v252_v49 = vsub.f32 1.5, %v251_v46  ;;  %v260_v50 = vmul.f32 %v359_v42, %v259_v47 }
 0x22b   :  { %v294_v51 = vadd.f32 %v351_v43, %v286_v48 }
 0x22c   :  { %v253_v52 = vmul.f32 %v357_v34, %v252_v49  ;;  %v261_v53 = vmul.f32 0.5, %v260_v50 }
 0x22d   :  { %298 = vst.msk [vmem:[%s514_s7] sm:$0xff] %vm31_vm0, %v294_v51 }
 0x22e   :  { %v257_v54 = vsel %vm256_vm8, %v357_v34, %v253_v52  ;;  %v262_v55 = vsub.f32 1.5, %v261_v53 }
 0x22f   :  { %v361_v56 = vpop.eup %360  ;;  %v279_v57 = vmul.f32 %v257_v54, %v467_v7 }
 0x230   :  { %v263_v58 = vmul.f32 %v359_v42, %v262_v55  ;;  %v269_v59 = vmul.f32 %v361_v56, %v237_v45  ;;  %vm275_vm12 = vweird.f32 %v361_v56 }
 0x231   :  { %v287_v60 = vmul.f32 %v350_v38, %v279_v57  ;;  %vm276_vm14 = vmor %vm274_vm13, %vm275_vm12 }
 0x232   :  { %v267_v61 = vsel %vm266_vm11, %v359_v42, %v263_v58  ;;  %v270_v62 = vmul.f32 %v361_v56, %v269_v59 }
 0x233   :  { %v295_v63 = vadd.f32 %v351_v43, %v287_v60  ;;  %v280_v0 = vmul.f32 %v267_v61, %v471_v11 }
 0x234   :  { %v271_v1 = vmul.f32 0.5, %v270_v62 }
 0x235   :  { %299 = vst.msk [vmem:[%s514_s7 + $0x8] sm:$0xff] %vm31_vm0, %v295_v63  ;;  %v288_v2 = vmul.f32 %v350_v38, %v280_v0 }
 0x236   :  { %v272_v3 = vsub.f32 1.5, %v271_v1 }
 0x237   :  { %v296_v4 = vadd.f32 %v351_v43, %v288_v2 }
 0x238   :  { %v273_v5 = vmul.f32 %v361_v56, %v272_v3 }
 0x239   :  { %300 = vst.msk [vmem:[%s514_s7 + $0x10] sm:$0xff] %vm31_vm0, %v296_v4 }
 0x23a   :  { %v277_v6 = vsel %vm276_vm14, %v361_v56, %v273_v5 }
 0x23b   :  { %v281_v7 = vmul.f32 %v277_v6, %v477_v17 }
 0x23d   :  { %v289_v8 = vmul.f32 %v350_v38, %v281_v7 }
 0x23f   :  { %v297_v9 = vadd.f32 %v351_v43, %v289_v8 }
 0x241   :  { %301 = vst.msk [vmem:[%s514_s7 + $0x18] sm:$0xff] %vm31_vm0, %v297_v9 }

// kernel: nstack_merge_encoder_layer.2
= control target key start
LH: loop header
LB: loop body
LE: loop exit
PB: predicated region body
PF: predicated region fallthrough
CT: control target
= control target key end

     0   :  { %s1813_s0 = inlined_call_operand.vmem [shape: f32[2,16,32], index: 0, kind: input, shape index: {}]   ;;  %s1814_s1 = inlined_call_operand.vmem [shape: bf16[32,96], index: 1, kind: input, shape index: {}]   ;;  %s1815_s2 = inlined_call_operand.vmem [shape: f32[1,96], index: 2, kind: input, shape index: {}]   ;;  %s1816_s3 = inlined_call_operand.vmem [shape: bf16[32,32], index: 3, kind: input, shape index: {}]   ;;  %s1817_s4 = inlined_call_operand.vmem [shape: f32[1,32], index: 4, kind: input, shape index: {}]   ;;  %s1818_s5 = inlined_call_operand.vmem [shape: f32[2,1,16], index: 5, kind: input, shape index: {}]   ;;  %s1819_s6 = inlined_call_operand.vmem [shape: f32[1,32], index: 6, kind: input, shape index: {}]   ;;  %s1820_s7 = inlined_call_operand.vmem [shape: f32[1,32], index: 7, kind: input, shape index: {}]   ;;  %s1821_s8 = inlined_call_operand.vmem [shape: f32[2,16,32], index: 8, kind: output, shape index: {0}]   ;;  %s1822_s9 = inlined_call_operand.hbm [shape: f32[2,16,16], index: 9, kind: output, shape index: {1}]  }
   0x1   :  { %1825 = sst [smem:[#allocation7_spill]] %s1813_s0 }
   0x2   :  { %1826 = sst [smem:[#allocation8_spill]] %s1814_s1 }
   0x3   :  { %1827 = sst [smem:[#allocation9_spill]] %s1815_s2 }
   0x4   :  { %1828 = sst [smem:[#allocation10_spill]] %s1816_s3 }
   0x5   :  { %15 = vsyncpa [#allocation5], 0 }
   0x6   :  { %17 = vsyncpa [#allocation5 + $0x1], 0  ;;  %s1528_s30 = smov 0   ;;  %s1530_s10 = smov 0  }
   0x7   :  { %s1532_s11 = smov 0   ;;  %s1534_s12 = smov 0  }
   0x8   :  { %s1536_s13 = smov 0   ;;  %s1538_s14 = smov 0  }
   0x9 LB: > { %s1190_s15 = sadd.s32 4294967295, %s1460_s14   ;;  %s1191_s16 = sadd.s32 4294967294, %s1460_s14   ;;  %s1460_s14 = sphi %s1538_s14, %s23_s14   ;;  %s1456_s13 = sphi %s1536_s13, %s1841_s13   ;;  %s1452_s12 = sphi %s1534_s12, %s1840_s12   ;;  %s1448_s11 = sphi %s1532_s11, %s1839_s11   ;;  %s1444_s10 = sphi %s1530_s10, %s1838_s10   ;;  %s1440_s30 = sphi %s1528_s30, %s1837_s30  }
   0xa   : > { %s35_s17 = sadd.s32 1, %s1456_s13  ;;  %s250_s18 = sadd.s32 1, %s1448_s11 }
   0xb   : > { %p37_p0 = scmp.ge.s32.totalorder %s35_s17, 2  ;;  %p260_p1 = scmp.ne.s32.totalorder %s1448_s11, %s1444_s10 }
   0xc   : > { %p261_p2 = scmp.eq.s32.totalorder %s1190_s15, 1  ;;  %p266_p3 = scmp.ne.s32.totalorder %s1444_s10, %s1440_s30 }
   0xd   : > { %s1843_s17 = smov (%p37_p0, %s35_s17), 0  ;;  %p267_p5 = scmp.eq.s32.totalorder %s1191_s16, 1 }
   0xe   : > { %p1568_p4 = por %p261_p2, %p260_p1  ;;  %s245_s20 = ssub.s32 %s1456_s13, %s1843_s17 }
   0xf   : > { %p1194_p6 = scmp.ge.s32.totalorder %s1460_s14, 1  ;;  %p248_p7 = scmp.eq.s32.totalorder %s245_s20, 0 }
  0x10   : > { %p1575_p8 = por %p267_p5, %p266_p3  ;;  %p317_p9 = scmp.lt.s32.totalorder %s1460_s14, 3 }
  0x11   : > { %s1581_s22 = scalar_select %p248_p7, %s1448_s11, %s250_s18  }
  0x12   : > { %p318_p10 = pnand %p1194_p6, %p317_p9 }
  0x13   : > { %s1831_s1 = sld [smem:[#allocation8_spill]] (!%p318_p10)  ;;  %p365_p11 = scmp.lt.s32.totalorder (!%p318_p10), %s1452_s12, 1 }
  0x14   : > { %321 = sbr.rel (%p318_p10) target bundleno = 1457 (0x5b1), region = 52  ;;  %s1832_s0 = sld [smem:[#allocation7_spill]] (!%p318_p10) }
  0x15   : > { %s1833_s2 = sld [smem:[#allocation9_spill]] (!%p318_p10)  ;;  %s1462_s26 = smov (!%p318_p10), 96  }
  0x16   : > { %s1463_s29 = smov (!%p318_p10), 104   ;;  %s1464_s15 = smov (!%p318_p10), 120  }
  0x17   : > { %s1465_s18 = smov (!%p318_p10), 88   ;;  %s1466_s20 = smov (!%p318_p10), 80  }
  0x18   : > { %s1468_s24 = smov (!%p318_p10), 112   ;;  %s1824_s25 = smov (!%p318_p10), 8  }
  0x19   : > { %v1258_v0 = vld [vmem:[%s1831_s1 + $0x8] sm:$0xff]  ;;  %v1257_v1 = vld [vmem:[%s1831_s1] sm:$0xff]  ;;  %s1591_s27 = scalar_select %p365_p11, %s1452_s12, 1  ;;  %vm412_vm0 = vcmask 261120   ;;  %vm432_vm1 = vcmask 781312   ;;  %vm460_vm2 = vcmask 64512  }
  0x1a   : > { %422 = vmatpush.bf16.msra.mxu0 %v1258_v0  ;;  %vm481_vm3 = vcmask 130048   ;;  %s1834_s3 = sld [smem:[#allocation10_spill]] }
  0x1b   : > { %s1823_s28 = sshll.u32 %s1591_s27, 4  ;;  %s372_s16 = scalar_lea.vmem %s1818_s5, %s1591_s27  ;;  %v1340_v5 = vld [vmem:[%s1833_s2] ss:$0 sm:$0xff] }
  0x1c   : > { %s369_s23 = scalar_lea.vmem %s1832_s0, %s1823_s28  ;;  %v1339_v28 = vld [vmem:[%s372_s16] ss:$0 sm:$0xff]  ;;  %s1469_s16 = smov 64  }
  0x1d   : > { %v1603_v2 = vld [vmem:[%s369_s23] sm:$0xff]  ;;  %v1605_v3 = vld [vmem:[%s369_s23 + $0x8] sm:$0xff]  ;;  %s1467_s23 = smov 72  }
  0x1e   : > { %423 = vmatpush.bf16.msra.mxu0 %v1257_v1  ;;  %v391_v4 = vpack.c.bf16 %v1605_v3, %v1603_v2 }
  0x21   : > { %1208 = vmatmul.msk.bf16.vlgmr.msra.gmra.mxu0 %vm412_vm0, %v391_v4 }
  0x9e   : > { %v425_v6 = vpop.f32.mrf.mxu0 }
  0x9f   : > { %v426_v7 = vadd.f32 %v1340_v5, %v425_v6 }
  0xa1   : > { %v430_v8 = vpack.c.bf16 %v426_v7, %v426_v7 }
  0xa3   : > { %433 = vst.msk [vmem:[#allocation2] sm:$0xf] %vm432_vm1, %v430_v8 }
  0xa6   : > { %v427_v9 = vpop.f32.mrf.mxu0 }
  0xa7   : > { %v428_v10 = vadd.f32 %v1340_v5, %v427_v9 }
  0xa9   : > { %v431_v11 = vpack.c.bf16 %v428_v10, %v428_v10 }
  0xab   : > { %434 = vst.msk [vmem:[#allocation2 + $0x4] sm:$0xf] %vm432_vm1, %v431_v11 }
  0xb2   : > { %v1613_v12 = vld [vmem:[#allocation2] sm:$0xff] }
  0xb3   : > { %v1259_v13 = vld [vmem:[#allocation2] sm:$0xff]  ;;  %458 = vrot.lane.b32.xlu0 %v1613_v12, %s1462_s26  ;;  %s1474_s26 = smov 16  }
  0xb4   : > { %798 = vrot.lane.b32.xlu2 %v1259_v13, %s1463_s29  ;;  %560 = vrot.lane.b32.xlu1 %v1259_v13, %s1464_s15  ;;  %v1616_v14 = vld [vmem:[#allocation2] sm:$0xff]  ;;  %s1470_s29 = smov 56   ;;  %s1471_s15 = smov 40  }
  0xb5   : > { %v1618_v15 = vld [vmem:[#allocation2] sm:$0xff] }
  0xb6   : > { %v1620_v16 = vld [vmem:[#allocation2] sm:$0xff] }
  0xbb   : > { %567 = vrot.lane.b32.xlu0 %v1616_v14, %s1465_s18  ;;  %s1472_s18 = smov 48  }
  0xbc   : > { %686 = vrot.lane.b32.xlu2 %v1618_v15, %s1466_s20  ;;  %805 = vrot.lane.b32.xlu1 %v1620_v16, %s1467_s23  ;;  %s362_s20 = sand.u32 1, %s1444_s10  }
  0xbd   : > { %s1195_s23 = sshll.u32 %s362_s20, 4  ;;  %s1046_s28 = scalar_lea.sflag [#allocation5], %s362_s20 }
  0xc3   : > { %679 = vrot.lane.b32.xlu0 %v1259_v13, %s1468_s24  ;;  %s1690_s24 = scalar_lea.vmem [#allocation4], %s1195_s23 }
 0x10e   : > { %v799_v17 = vpop.permute.xlu2 %798 }
 0x116   : > { %v687_v18 = vpop.permute.xlu2 %686 }
 0x117   : > { %v692_v19 = vsel %vm460_vm2, %v687_v18, 0 }
 0x118   : > { %701 = vmatpush.bf16.xpose.msrb.mxu0 %v692_v19 }
 0x125   : > { %v459_v20 = vpop.permute.xlu0 %458 }
 0x126   : > { %v561_v21 = vpop.permute.xlu1 %560  ;;  %v465_v22 = vsel %vm460_vm2, %v459_v20, 0 }
 0x127   : > { %474 = vmatpush.bf16.xpose.msra.mxu1 %v465_v22 }
 0x12d   : > { %v568_v23 = vpop.permute.xlu0 %567 }
 0x12e   : > { %v806_v24 = vpop.permute.xlu1 %805  ;;  %1217 = vmatmul.msk.bf16.vlgmr.msra.gmra.mxu1 %vm460_vm2, %v1259_v13  ;;  %v573_v25 = vsel %vm460_vm2, %v568_v23, 0 }
 0x12f   : > { %582 = vmatpush.bf16.xpose.msra.mxu3 %v573_v25  ;;  %v811_v26 = vsel %vm460_vm2, %v806_v24, 0 }
 0x135   : > { %v680_v27 = vpop.permute.xlu0 %679 }
 0x136   : > { %1223 = vmatmul.msk.bf16.vlgmr.msra.gmra.mxu3 %vm460_vm2, %v561_v21  ;;  %1229 = vmatmul.msk.bf16.vlgmr.msrb.gmra.mxu0 %vm460_vm2, %v680_v27 }
 0x137   : > { %820 = vmatpush.bf16.xpose.msrb.mxu3 %v811_v26 }
 0x146   : > { %1235 = vmatmul.msk.bf16.vlgmr.msrb.gmra.mxu3 %vm460_vm2, %v799_v17 }
 0x1ab   : > { %v476_v29 = vpop.f32.mrf.mxu1 }
 0x1ac   : > { %v477_v30 = vadd.f32 %v1339_v28, %v476_v29 }
 0x1ae   : > { %v482_v31 = vsel %vm481_vm3, %v477_v30, -inf }
 0x1af   : > { %483 = vmax.xlane.f32.xlu1 %v482_v31 }
 0x1b3   : > { %v478_v32 = vpop.f32.mrf.mxu1  ;;  %v703_v33 = vpop.f32.mrf.mxu0 }
 0x1b4   : > { %v479_v34 = vadd.f32 %v1339_v28, %v478_v32  ;;  %v704_v42 = vadd.f32 %v1339_v28, %v703_v33 }
 0x1b6   : > { %v485_v35 = vsel %vm481_vm3, %v479_v34, -inf  ;;  %v708_v45 = vsel %vm481_vm3, %v704_v42, -inf }
 0x1b7   : > { %486 = vmax.xlane.f32.xlu2 %v485_v35 }
 0x1b9   : > { %v584_v36 = vpop.f32.mrf.mxu3 }
 0x1ba   : > { %v585_v37 = vadd.f32 %v1339_v28, %v584_v36 }
 0x1bb   : > { %v705_v38 = vpop.f32.mrf.mxu0 }
 0x1bc   : > { %v1640_v39 = vadd.f32 %v1339_v28, %v705_v38  ;;  %v589_v40 = vsel %vm481_vm3, %v585_v37, -inf }
 0x1bd   : > { %590 = vmax.xlane.f32.xlu0 %v589_v40 }
 0x1be   : > { %v711_v41 = vsel %vm481_vm3, %v1640_v39, -inf }
 0x1bf   : > { %712 = vmax.xlane.f32.xlu1 %v711_v41 }
 0x1c1   : > { %v586_v43 = vpop.f32.mrf.mxu3 }
 0x1c2   : > { %v587_v44 = vadd.f32 %v1339_v28, %v586_v43 }
 0x1c4   : > { %v592_v46 = vsel %vm481_vm3, %v587_v44, -inf }
 0x1c5   : > { %709 = vmax.xlane.f32.xlu0 %v708_v45  ;;  %593 = vmax.xlane.f32.xlu2 %v592_v46 }
 0x1c9   : > { %v822_v47 = vpop.f32.mrf.mxu3 }
 0x1ca   : > { %v823_v48 = vadd.f32 %v1339_v28, %v822_v47 }
 0x1cc   : > { %v827_v49 = vsel %vm481_vm3, %v823_v48, -inf }
 0x1cd   : > { %828 = vmax.xlane.f32.xlu1 %v827_v49 }
 0x1d1   : > { %v824_v50 = vpop.f32.mrf.mxu3 }
 0x1d2   : > { %v825_v51 = vadd.f32 %v1339_v28, %v824_v50 }
 0x1d4   : > { %v830_v52 = vsel %vm481_vm3, %v825_v51, -inf }
 0x1d5   : > { %831 = vmax.xlane.f32.xlu2 %v830_v52 }
 0x222   : > { %v484_v53 = vpop.xlane.xlu1 %483 }
 0x223   : > { %v488_v54 = vsub.f32 %v477_v30, %v484_v53 }
 0x225   : > { %v490_v55 = vmul.f32 1.442695, %v488_v54 }
 0x227   : > { %1344 = vpow2.f32 %v490_v55 }
 0x22a   : > { %v487_v56 = vpop.xlane.xlu2 %486 }
 0x22b   : > { %v489_v57 = vsub.f32 %v479_v34, %v487_v56 }
 0x22d   : > { %v1649_v58 = vpop.eup %1344  ;;  %v492_v59 = vmul.f32 1.442695, %v489_v57 }
 0x22e   : > { %v494_v60 = vsel %vm481_vm3, %v1649_v58, 0.0 }
 0x22f   : > { %1346 = vpow2.f32 %v492_v59  ;;  %495 = vadd.xlane.f32.xlu2 %v494_v60 }
 0x230   : > { %v591_v61 = vpop.xlane.xlu0 %590 }
 0x231   : > { %v595_v62 = vsub.f32 %v585_v37, %v591_v61 }
 0x232   : > { %v713_v25 = vpop.xlane.xlu1 %712 }
 0x233   : > { %v597_v63 = vmul.f32 1.442695, %v595_v62  ;;  %v715_v26 = vsub.f32 %v1640_v39, %v713_v25 }
 0x235   : > { %v1653_v0 = vpop.eup %1346  ;;  %1348 = vpow2.f32 %v597_v63  ;;  %v718_v27 = vmul.f32 1.442695, %v715_v26 }
 0x236   : > { %v497_v1 = vsel %vm481_vm3, %v1653_v0, 0.0 }
 0x237   : > { %498 = vadd.xlane.f32.xlu0 %v497_v1 }
 0x238   : > { %v710_v4 = vpop.xlane.xlu0 %709  ;;  %v594_v5 = vpop.xlane.xlu2 %593 }
 0x239   : > { %v714_v6 = vsub.f32 %v704_v42, %v710_v4  ;;  %v596_v9 = vsub.f32 %v587_v44, %v594_v5 }
 0x23b   : > { %v1657_v7 = vpop.eup %1348  ;;  %v716_v8 = vmul.f32 1.442695, %v714_v6  ;;  %v599_v11 = vmul.f32 1.442695, %v596_v9 }
 0x23c   : > { %v601_v10 = vsel %vm481_vm3, %v1657_v7, 0.0 }
 0x23d   : > { %1350 = vpow2.f32 %v716_v8  ;;  %602 = vadd.xlane.f32.xlu1 %v601_v10 }
 0x23e   : > { %1352 = vpow2.f32 %v599_v11 }
 0x243   : > { %v1661_v13 = vpop.eup %1350 }
 0x244   : > { %v720_v17 = vsel %vm481_vm3, %v1661_v13, 0.0  ;;  %v1665_v19 = vpop.eup %1352 }
 0x245   : > { %721 = vadd.xlane.f32.xlu2 %v720_v17  ;;  %v604_v22 = vsel %vm481_vm3, %v1665_v19, 0.0 }
 0x248   : > { %v832_v18 = vpop.xlane.xlu2 %831 }
 0x249   : > { %v834_v20 = vsub.f32 %v825_v51, %v832_v18 }
 0x24b   : > { %v837_v21 = vmul.f32 1.442695, %v834_v20  ;;  %533 = vrot.lane.b32.xlu0 %v1613_v12, %s1469_s16  ;;  %v829_v12 = vpop.xlane.xlu1 %828  ;;  %s1475_s16 = smov 24  }
 0x24c   : > { %v833_v28 = vsub.f32 %v823_v48, %v829_v12 }
 0x24d   : > { %1354 = vpow2.f32 %v837_v21  ;;  %605 = vadd.xlane.f32.xlu2 %v604_v22 }
 0x24e   : > { %1356 = vpow2.f32 %v718_v27  ;;  %v835_v30 = vmul.f32 1.442695, %v833_v28 }
 0x250   : > { %1358 = vpow2.f32 %v835_v30 }
 0x253   : > { %v1670_v23 = vpop.eup %1354 }
 0x254   : > { %v842_v24 = vsel %vm481_vm3, %v1670_v23, 0.0  ;;  %v1677_v29 = vpop.eup %1356 }
 0x255   : > { %843 = vadd.xlane.f32.xlu2 %v842_v24  ;;  %v723_v31 = vsel %vm481_vm3, %v1677_v29, 0.0 }
 0x256   : > { %644 = vrot.lane.b32.xlu1 %v1616_v14, %s1470_s29  ;;  %v1681_v14 = vpop.eup %1358  ;;  %s1267_s29 = sshll.u32 %s1452_s12, 4  ;;  %s1402_s12 = scalar_lea.hbm %s1822_s9, 32 }
 0x257   : > { %v839_v32 = vsel %vm481_vm3, %v1681_v14, 0.0  ;;  %s1063_s23 = scalar_lea.hbm %s1822_s9, %s1267_s29 }
 0x26d   : > { %882 = vrot.lane.b32.xlu2 %v1620_v16, %s1471_s15 }
 0x275   : > { %724 = vadd.xlane.f32.xlu0 %v723_v31 }
 0x280   : > { %840 = vadd.xlane.f32.xlu1 %v839_v32 }
 0x299   : > { %763 = vrot.lane.b32.xlu1 %v1618_v15, %s1472_s18 }
 0x2a2   : > { %v496_v16 = vpop.xlane.xlu2 %495 }
 0x2a3   : > { %1360 = vrcp.f32 %v496_v16  ;;  %v511_v37 = vand.u32 2147483648, %v496_v16  ;;  %v509_v39 = vand.u32 2147483647, %v496_v16  ;;  %vm505_vm5 = vweird.f32 %v496_v16 }
 0x2a5   : > { %v512_v15 = vor.u32 1.1754944e-38, %v511_v37  ;;  %vm510_vm7 = vcmp.eq.f32.partialorder %v509_v39, 8.507059e+37 }
 0x2a9   : > { %v1361_v33 = vpop.eup %1360 }
 0x2aa   : > { %v501_v34 = vmul.f32 %v1361_v33, %v496_v16  ;;  %v499_v35 = vpop.xlane.xlu0 %498  ;;  %vm506_vm4 = vweird.f32 %v1361_v33 }
 0x2ab   : > { %1362 = vrcp.f32 %v499_v35  ;;  %vm507_vm6 = vmor %vm505_vm5, %vm506_vm4  ;;  %v526_v48 = vand.u32 2147483648, %v499_v35  ;;  %v524_v50 = vand.u32 2147483647, %v499_v35  ;;  %vm520_vm9 = vweird.f32 %v499_v35 }
 0x2ac   : > { %v502_v36 = vsub.f32 1.0, %v501_v34 }
 0x2ad   : > { %v527_v55 = vor.u32 1.1754944e-38, %v526_v48  ;;  %vm525_vm11 = vcmp.eq.f32.partialorder %v524_v50, 8.507059e+37 }
 0x2ae   : > { %v503_v38 = vmul.f32 %v1361_v33, %v502_v36 }
 0x2b0   : > { %v504_v40 = vadd.f32 %v1361_v33, %v503_v38  ;;  %v603_v41 = vpop.xlane.xlu1 %602 }
 0x2b1   : > { %v1363_v42 = vpop.eup %1362  ;;  %1364 = vrcp.f32 %v603_v41  ;;  %v618_v60 = vand.u32 2147483648, %v603_v41  ;;  %v616_v62 = vand.u32 2147483647, %v603_v41  ;;  %vm612_vm13 = vweird.f32 %v603_v41 }
 0x2b2   : > { %v516_v43 = vmul.f32 %v1363_v42, %v499_v35  ;;  %v508_v44 = vsel %vm507_vm6, %v1361_v33, %v504_v40  ;;  %vm521_vm8 = vweird.f32 %v1363_v42 }
 0x2b3   : > { %v513_v45 = vsel %vm510_vm7, %v512_v15, %v508_v44  ;;  %vm522_vm10 = vmor %vm520_vm9, %vm521_vm8  ;;  %v619_v8 = vor.u32 1.1754944e-38, %v618_v60  ;;  %vm617_vm15 = vcmp.eq.f32.partialorder %v616_v62, 8.507059e+37 }
 0x2b4   : > { %v517_v46 = vsub.f32 1.0, %v516_v43  ;;  %v514_v47 = vmul.f32 %v1649_v58, %v513_v45 }
 0x2b6   : > { %v518_v49 = vmul.f32 %v1363_v42, %v517_v46  ;;  %530 = vst.msk [vmem:[%s1690_s24] sm:$0xff] %vm481_vm3, %v514_v47 }
 0x2b7   : > { %v1365_v51 = vpop.eup %1364 }
 0x2b8   : > { %v519_v52 = vadd.f32 %v1363_v42, %v518_v49  ;;  %v608_v53 = vmul.f32 %v1365_v51, %v603_v41  ;;  %v722_v54 = vpop.xlane.xlu2 %721  ;;  %vm613_vm12 = vweird.f32 %v1365_v51 }
 0x2b9   : > { %1366 = vrcp.f32 %v722_v54  ;;  %vm614_vm14 = vmor %vm612_vm13, %vm613_vm12  ;;  %v737_v20 = vand.u32 2147483648, %v722_v54  ;;  %v735_v22 = vand.u32 2147483647, %v722_v54  ;;  %vm731_vm2 = vweird.f32 %v722_v54 }
 0x2ba   : > { %v609_v56 = vsub.f32 1.0, %v608_v53  ;;  %v523_v57 = vsel %vm522_vm10, %v1363_v42, %v519_v52 }
 0x2bb   : > { %v528_v58 = vsel %vm525_vm11, %v527_v55, %v523_v57  ;;  %v738_v12 = vor.u32 1.1754944e-38, %v737_v20  ;;  %vm736_vm5 = vcmp.eq.f32.partialorder %v735_v22, 8.507059e+37 }
 0x2bc   : > { %v610_v59 = vmul.f32 %v1365_v51, %v609_v56  ;;  %v529_v61 = vmul.f32 %v1653_v0, %v528_v58 }
 0x2bd   : > { %v534_v63 = vpop.permute.xlu0 %533  ;;  %v637_v21 = vld [vmem:[%s1690_s24] sm:$0xff] }
 0x2be   : > { %v611_v1 = vadd.f32 %v1365_v51, %v610_v59  ;;  %546 = vmatpush.bf16.msra.mxu2 %v534_v63  ;;  %531 = vst.msk [vmem:[%s1690_s24 + $0x8] sm:$0xff] %vm481_vm3, %v529_v61  ;;  %v532_v4 = vpack.c.bf16 %v529_v61, %v514_v47 }
 0x2bf   : > { %v1367_v5 = vpop.eup %1366 }
 0x2c0   : > { %v615_v6 = vsel %vm614_vm14, %v1365_v51, %v611_v1  ;;  %v727_v9 = vmul.f32 %v1367_v5, %v722_v54  ;;  %v606_v10 = vpop.xlane.xlu2 %605  ;;  %vm732_vm1 = vweird.f32 %v1367_v5 }
 0x2c1   : > { %1368 = vrcp.f32 %v606_v10  ;;  %1218 = vmatmul.msk.bf16.vlgmr.msra.gmra.mxu2 %vm481_vm3, %v532_v4  ;;  %v620_v11 = vsel %vm617_vm15, %v619_v8, %v615_v6  ;;  %vm733_vm4 = vmor %vm731_vm2, %vm732_vm1  ;;  %v633_v16 = vand.u32 2147483648, %v606_v10  ;;  %v631_v34 = vand.u32 2147483647, %v606_v10 }
 0x2c2   : > { %v728_v0 = vsub.f32 1.0, %v727_v9  ;;  %v621_v17 = vmul.f32 %v1657_v7, %v620_v11  ;;  %vm627_vm7 = vweird.f32 %v606_v10 }
 0x2c3   : > { %v634_v38 = vor.u32 1.1754944e-38, %v633_v16  ;;  %vm632_vm9 = vcmp.eq.f32.partialorder %v631_v34, 8.507059e+37 }
 0x2c4   : > { %v729_v18 = vmul.f32 %v1367_v5, %v728_v0  ;;  %v639_v24 = vadd.f32 %v637_v21, %v621_v17 }
 0x2c5   : > { %v638_v43 = vld [vmem:[%s1690_s24 + $0x8] sm:$0xff] }
 0x2c6   : > { %v730_v25 = vadd.f32 %v1367_v5, %v729_v18  ;;  %641 = vst.msk [vmem:[%s1690_s24] sm:$0xff] %vm481_vm3, %v639_v24 }
 0x2c7   : > { %v1369_v26 = vpop.eup %1368 }
 0x2c8   : > { %v734_v27 = vsel %vm733_vm4, %v1367_v5, %v730_v25  ;;  %v623_v28 = vmul.f32 %v1369_v26, %v606_v10  ;;  %v1702_v30 = vpop.xlane.xlu2 %843  ;;  %v645_v31 = vpop.permute.xlu1 %644  ;;  %vm628_vm6 = vweird.f32 %v1369_v26 }
 0x2c9   : > { %657 = vmatpush.bf16.msrb.mxu2 %v645_v31  ;;  %v739_v32 = vsel %vm736_vm5, %v738_v12, %v734_v27  ;;  %vm629_vm8 = vmor %vm627_vm7, %vm628_vm6  ;;  %1370 = vrcp.f32 %v1702_v30  ;;  %v871_v63 = vand.u32 2147483648, %v1702_v30  ;;  %vm865_vm15 = vweird.f32 %v1702_v30 }
 0x2ca   : > { %v624_v7 = vsub.f32 1.0, %v623_v28  ;;  %v1705_v35 = vmul.f32 %v1661_v13, %v739_v32  ;;  %v869_v5 = vand.u32 2147483647, %v1702_v30 }
 0x2cb   : > { %v872_v0 = vor.u32 1.1754944e-38, %v871_v63 }
 0x2cc   : > { %v625_v33 = vmul.f32 %v1369_v26, %v624_v7  ;;  %vm870_vm4 = vcmp.eq.f32.partialorder %v869_v5, 8.507059e+37 }
 0x2cd   : > { %v756_v37 = vld [vmem:[%s1690_s24] sm:$0xff] }
 0x2ce   : > { %v626_v36 = vadd.f32 %v1369_v26, %v625_v33  ;;  %v758_v39 = vadd.f32 %v756_v37, %v1705_v35 }
 0x2cf   : > { %v1371_v46 = vpop.eup %1370 }
 0x2d0   : > { %v630_v40 = vsel %vm629_vm8, %v1369_v26, %v626_v36  ;;  %v883_v41 = vpop.permute.xlu2 %882  ;;  %760 = vst.msk [vmem:[%s1690_s24] sm:$0xff] %vm481_vm3, %v758_v39  ;;  %v861_v47 = vmul.f32 %v1371_v46, %v1702_v30  ;;  %vm866_vm14 = vweird.f32 %v1371_v46  ;;  %vm555_vm8 = vcmask 60416  }
 0x2d1   : > { %895 = vmatpush.bf16.msra.mxu2 %v883_v41  ;;  %v635_v42 = vsel %vm632_vm9, %v634_v38, %v630_v40  ;;  %vm867_vm1 = vmor %vm865_vm15, %vm866_vm14  ;;  %vm793_vm9 = vcmask 191616  }
 0x2d2   : > { %v636_v15 = vmul.f32 %v1665_v19, %v635_v42  ;;  %v862_v50 = vsub.f32 1.0, %v861_v47 }
 0x2d4   : > { %v640_v13 = vadd.f32 %v638_v43, %v636_v15  ;;  %v643_v44 = vpack.c.bf16 %v636_v15, %v621_v17  ;;  %v863_v55 = vmul.f32 %v1371_v46, %v862_v50  ;;  %v1265_v50 = vld [vmem:[%s1834_s3] sm:$0xff] }
 0x2d6   : > { %642 = vst.msk [vmem:[%s1690_s24 + $0x8] sm:$0xff] %vm481_vm3, %v640_v13  ;;  %1224 = vmatmul.msk.bf16.vlgmr.msrb.gmra.mxu2 %vm481_vm3, %v643_v44  ;;  %v864_v61 = vadd.f32 %v1371_v46, %v863_v55  ;;  %v1341_v55 = vld [vmem:[%s1817_s4] ss:$0 sm:$0xff] }
 0x2d7   : > { %v875_v27 = vld [vmem:[%s1690_s24] sm:$0xff] }
 0x2d8   : > { %v868_v9 = vsel %vm867_vm1, %v1371_v46, %v864_v61 }
 0x2d9   : > { %v873_v17 = vsel %vm870_vm4, %v872_v0, %v868_v9 }
 0x2da   : > { %v874_v22 = vmul.f32 %v1670_v23, %v873_v17 }
 0x2dd   : > { %v757_v4 = vld [vmem:[%s1690_s24 + $0x8] sm:$0xff] }
 0x2e8   : > { %v725_v45 = vpop.xlane.xlu0 %724 }
 0x2e9   : > { %1372 = vrcp.f32 %v725_v45  ;;  %v752_v52 = vand.u32 2147483648, %v725_v45  ;;  %v750_v54 = vand.u32 2147483647, %v725_v45  ;;  %vm746_vm11 = vweird.f32 %v725_v45 }
 0x2eb   : > { %v753_v57 = vor.u32 1.1754944e-38, %v752_v52  ;;  %vm751_vm13 = vcmp.eq.f32.partialorder %v750_v54, 8.507059e+37 }
 0x2ef   : > { %v1373_v48 = vpop.eup %1372 }
 0x2f0   : > { %v742_v49 = vmul.f32 %v1373_v48, %v725_v45  ;;  %vm747_vm10 = vweird.f32 %v1373_v48 }
 0x2f1   : > { %vm748_vm12 = vmor %vm746_vm11, %vm747_vm10  ;;  %vm912_vm10 = vcmask 257216  }
 0x2f2   : > { %v743_v51 = vsub.f32 1.0, %v742_v49  ;;  %v1266_v49 = vld [vmem:[%s1834_s3 + $0x8] sm:$0xff] }
 0x2f3   : > { %v841_v19 = vpop.xlane.xlu1 %840  ;;  %958 = vmatpush.bf16.msra.mxu0 %v1266_v49 }
 0x2f4   : > { %v744_v53 = vmul.f32 %v1373_v48, %v743_v51  ;;  %1374 = vrcp.f32 %v841_v19  ;;  %v856_v10 = vand.u32 2147483648, %v841_v19  ;;  %vm850_vm5 = vweird.f32 %v841_v19 }
 0x2f6   : > { %v745_v56 = vadd.f32 %v1373_v48, %v744_v53  ;;  %v857_v20 = vor.u32 1.1754944e-38, %v856_v10 }
 0x2f7   : > { %959 = vmatpush.bf16.msra.mxu0 %v1265_v50 }
 0x2f8   : > { %v749_v58 = vsel %vm748_vm12, %v1373_v48, %v745_v56 }
 0x2f9   : > { %v754_v59 = vsel %vm751_vm13, %v753_v57, %v749_v58 }
 0x2fa   : > { %v1375_v60 = vpop.eup %1374  ;;  %v755_v62 = vmul.f32 %v1677_v29, %v754_v59  ;;  %v854_v29 = vand.u32 2147483647, %v841_v19 }
 0x2fb   : > { %v846_v1 = vmul.f32 %v1375_v60, %v841_v19  ;;  %vm851_vm2 = vweird.f32 %v1375_v60 }
 0x2fc   : > { %v759_v6 = vadd.f32 %v757_v4, %v755_v62  ;;  %vm852_vm6 = vmor %vm850_vm5, %vm851_vm2  ;;  %vm855_vm7 = vcmp.eq.f32.partialorder %v854_v29, 8.507059e+37  ;;  %v762_v23 = vpack.c.bf16 %v755_v62, %v1705_v35 }
 0x2fd   : > { %v847_v8 = vsub.f32 1.0, %v846_v1  ;;  %v1476_v1 = vmov 32.0  }
 0x2fe   : > { %761 = vst.msk [vmem:[%s1690_s24 + $0x8] sm:$0xff] %vm481_vm3, %v759_v6  ;;  %1376 = vrcp.f32 %v1476_v1 }
 0x2ff   : > { %v848_v11 = vmul.f32 %v1375_v60, %v847_v8 }
 0x301   : > { %v849_v18 = vadd.f32 %v1375_v60, %v848_v11 }
 0x303   : > { %v853_v21 = vsel %vm852_vm6, %v1375_v60, %v849_v18 }
 0x304   : > { %v858_v24 = vsel %vm855_vm7, %v857_v20, %v853_v21  ;;  %v1377_v4 = vpop.eup %1376 }
 0x305   : > { %v859_v25 = vmul.f32 %v1681_v14, %v858_v24  ;;  %v876_v26 = vld [vmem:[%s1690_s24 + $0x8] sm:$0xff]  ;;  %v978_v5 = vmul.f32 32.0, %v1377_v4  ;;  %vm982_vm11 = vweird.f32 %v1377_v4 }
 0x306   : > { %v878_v12 = vadd.f32 %v876_v26, %v874_v22 }
 0x307   : > { %v881_v28 = vpack.c.bf16 %v874_v22, %v859_v25  ;;  %v877_v30 = vadd.f32 %v875_v27, %v859_v25  ;;  %v979_v6 = vsub.f32 1.0, %v978_v5 }
 0x308   : > { %880 = vst.msk [vmem:[%s1690_s24 + $0x8] sm:$0xff] %vm481_vm3, %v878_v12 }
 0x309   : > { %1236 = vmatmul.msk.bf16.vlgmr.msra.gmra.mxu2 %vm481_vm3, %v881_v28  ;;  %879 = vst.msk [vmem:[%s1690_s24] sm:$0xff] %vm481_vm3, %v877_v30  ;;  %v980_v8 = vmul.f32 %v1377_v4, %v979_v6 }
 0x30b   : > { %v764_v31 = vpop.permute.xlu1 %763  ;;  %v981_v9 = vadd.f32 %v1377_v4, %v980_v8 }
 0x30c   : > { %776 = vmatpush.bf16.msrb.mxu1 %v764_v31 }
 0x30f   : > { %1230 = vmatmul.msk.bf16.vlgmr.msrb.gmra.mxu1 %vm481_vm3, %v762_v23  ;;  %v916_v14 = vld [vmem:[%s1690_s24 + $0x8] sm:$0xff] }
 0x310   : > { %v915_v7 = vld [vmem:[%s1690_s24] sm:$0xff]  ;;  %v918_v32 = vmul.f32 0.25, %v916_v14 }
 0x311   : > { %v917_v16 = vmul.f32 0.25, %v915_v7 }
 0x312   : > { %920 = vst.msk [vmem:[%s1690_s24 + $0x8] sm:$0xff] %vm481_vm3, %v918_v32 }
 0x313   : > { %919 = vst.msk [vmem:[%s1690_s24] sm:$0xff] %vm481_vm3, %v917_v16  ;;  %vm674_vm3 = vcmask 126016  }
 0x344   : > { %v548_v33 = vpop.f32.mrf.mxu2 }
 0x345   : > { %v553_v34 = vpack.c.bf16 %v548_v33, %v548_v33 }
 0x347   : > { %556 = vst.msk [vmem:[#allocation3] sm:$0xf] %vm555_vm8, %v553_v34 }
 0x34c   : > { %v550_v36 = vpop.f32.mrf.mxu2 }
 0x34d   : > { %v554_v37 = vpack.c.bf16 %v550_v36, %v550_v36 }
 0x34f   : > { %557 = vst.msk [vmem:[#allocation3 + $0x4] sm:$0xf] %vm555_vm8, %v554_v37 }
 0x359   : > { %v659_v38 = vpop.f32.mrf.mxu2 }
 0x35a   : > { %v664_v13 = vpack.c.bf16 %v659_v38, %v659_v38 }
 0x361   : > { %v661_v39 = vpop.f32.mrf.mxu2 }
 0x362   : > { %v665_v35 = vpack.c.bf16 %v661_v39, %v661_v39 }
 0x364   : > { %670 = vrot.lane.b32.xlu2 %v665_v35, %s1824_s25 }
 0x38c   : > { %v778_v40 = vpop.f32.mrf.mxu1  ;;  %v897_v41 = vpop.f32.mrf.mxu2 }
 0x38d   : > { %v783_v42 = vpack.c.bf16 %v778_v40, %v778_v40  ;;  %v902_v46 = vpack.c.bf16 %v897_v41, %v897_v41 }
 0x38f   : > { %787 = vrot.lane.b32.xlu1 %v783_v42, %s1474_s26 }
 0x394   : > { %v780_v15 = vpop.f32.mrf.mxu1  ;;  %v899_v43 = vpop.f32.mrf.mxu2 }
 0x395   : > { %v784_v44 = vpack.c.bf16 %v780_v15, %v780_v15  ;;  %v903_v45 = vpack.c.bf16 %v899_v43, %v899_v43 }
 0x397   : > { %908 = vrot.lane.b32.xlu0 %v903_v45, %s1475_s16  ;;  %668 = vrot.lane.b32.xlu1 %v664_v13, %s1824_s25 }
 0x398   : > { %789 = vrot.lane.b32.xlu2 %v784_v44, %s1474_s26  ;;  %s1064_s26 = sshll.u32 %s1690_s24, 4  ;;  %s1065_s26 = int_to_ptr.vmem [resolvable:$true] %s1064_s26 }
 0x39f   : > { %906 = vrot.lane.b32.xlu1 %v902_v46, %s1475_s16  ;;  %s1066_s16 = sshll.u32 %s1063_s23, 4  ;;  %s1067_s16 = int_to_ptr.hbm [resolvable:$true] %s1066_s16 }
 0x3a0   : > { %s1396_s25 = sshra.s32 %s1067_s16, 4  ;;  %s1397_s25 = int_to_ptr.hbm [resolvable:$true] %s1396_s25 }
 0x3a1   : > { %s1398_s0 = scalar_lea.hbm %s1397_s25, 16  ;;  %p1403_p1 = scmp.lt.s32.totalorder %s1397_s25, %s1822_s9 }
 0x3a2   : > { %p1399_p12 = scmp.ne.s32.totalorder %s1397_s25, %s1398_s0  ;;  %p1404_p2 = scmp.lt.s32.totalorder %s1402_s12, %s1398_s0 }
 0x3a4   : > { %p1400_p13 = pnand %p1399_p12, %p1568_p4  ;;  %p1405_p3 = por %p1404_p2, %p1403_p1 }
 0x3a6   : > { %p1401_p0 = pneg %p1400_p13 }
 0x3a8   : > { %p1406_p5 = pnand %p1405_p3, %p1401_p0 }
 0x3be   : > { %v671_v47 = vpop.permute.xlu2 %670 }
 0x3bf   : > { %676 = vst.msk [vmem:[#allocation3 + $0x4] sm:$0xf] %vm674_vm3, %v671_v47 }
 0x3f2   : > { %v790_v48 = vpop.permute.xlu2 %789 }
 0x3f3   : > { %795 = vst.msk [vmem:[#allocation3 + $0x4] sm:$0xf] %vm793_vm9, %v790_v48 }
 0x401   : > { %v788_v51 = vpop.permute.xlu1 %787 }
 0x409   : > { %v909_v52 = vpop.permute.xlu0 %908  ;;  %v669_v19 = vpop.permute.xlu1 %668 }
 0x40a   : > { %914 = vst.msk [vmem:[#allocation3 + $0x4] sm:$0xf] %vm912_vm10, %v909_v52 }
 0x40b   : > { %675 = vst.msk [vmem:[#allocation3] sm:$0xf] %vm674_vm3, %v669_v19 }
 0x40c   : > { %794 = vst.msk [vmem:[#allocation3] sm:$0xf] %vm793_vm9, %v788_v51 }
 0x411   : > { %v907_v53 = vpop.permute.xlu1 %906 }
 0x412   : > { %913 = vst.msk [vmem:[#allocation3] sm:$0xf] %vm912_vm10, %v907_v53 }
 0x419   : > { %v1264_v54 = vld [vmem:[#allocation3] sm:$0xff] }
 0x41a   : > { %1249 = vmatmul.msk.bf16.vlgmr.msra.gmra.mxu0 %vm412_vm0, %v1264_v54 }
 0x497   : > { %v961_v56 = vpop.f32.mrf.mxu0 }
 0x498   : > { %v962_v57 = vadd.f32 %v1341_v55, %v961_v56 }
 0x49a   : > { %v969_v58 = vadd.f32 %v962_v57, %v1603_v2  ;;  %v983_v2 = vsel %vm982_vm11, %v1377_v4, %v981_v9 }
 0x49c   : > { %v971_v59 = vsel %vm412_vm0, %v969_v58, 0.0 }
 0x49d   : > { %972 = vadd.xlane.f32.xlu2 %v971_v59 }
 0x49f   : > { %v963_v60 = vpop.f32.mrf.mxu0 }
 0x4a0   : > { %v964_v61 = vadd.f32 %v1341_v55, %v963_v60 }
 0x4a2   : > { %v970_v62 = vadd.f32 %v964_v61, %v1605_v3 }
 0x4a4   : > { %v974_v63 = vsel %vm412_vm0, %v970_v62, 0.0 }
 0x4a5   : > { %975 = vadd.xlane.f32.xlu1 %v974_v63 }
 0x510   : > { %v973_v10 = vpop.xlane.xlu2 %972 }
 0x511   : > { %v984_v0 = vmul.f32 %v983_v2, %v973_v10 }
 0x513   : > { %v986_v11 = vsub.f32 %v969_v58, %v984_v0 }
 0x515   : > { %v988_v29 = vmul.f32 %v986_v11, %v986_v11 }
 0x517   : > { %v990_v3 = vsel %vm412_vm0, %v988_v29, 0.0 }
 0x518   : > { %v976_v17 = vpop.xlane.xlu1 %975  ;;  %991 = vadd.xlane.f32.xlu0 %v990_v3 }
 0x519   : > { %v985_v18 = vmul.f32 %v983_v2, %v976_v17 }
 0x51b   : > { %v987_v20 = vsub.f32 %v970_v62, %v985_v18 }
 0x51d   : > { %v989_v21 = vmul.f32 %v987_v20, %v987_v20 }
 0x51f   : > { %v993_v22 = vsel %vm412_vm0, %v989_v21, 0.0 }
 0x520   : > { %994 = vadd.xlane.f32.xlu2 %v993_v22 }
 0x521   : > { %1409 = shalt.err (!%p1406_p5)
}
 0x522   : > { %s1477_s20 = smov 128   ;;  %s1835_s24 = smov 8   ;;  %v1342_v34 = vld [vmem:[%s1819_s6] ss:$0 sm:$0xff] }
 0x523   : > { %1268 = dma.vmem_to_hbm [thread:$0]  (%p1568_p4), %s1065_s26, 256, %s1067_s16, %s1046_s28, %s1477_s20, %s1477_s20, %s1835_s24  }
 0x524   : > { %v1343_v38 = vld [vmem:[%s1820_s7] ss:$0 sm:$0xff]  ;;  %s1836_s19 = sshll.u32 %s1591_s27, 4 }
 0x525   : > { %s381_s29 = scalar_lea.vmem %s1821_s8, %s1836_s19 }
 0x58b   : > { %v992_v24 = vpop.xlane.xlu0 %991 }
 0x58c   : > { %v996_v25 = vmul.f32 %v992_v24, %v983_v2 }
 0x58e   : > { %v998_v26 = vadd.f32 1e-05, %v996_v25 }
 0x590   : > { %1378 = vrsqrt.f32 %v998_v26  ;;  %vm1006_vm13 = vweird.f32 %v998_v26 }
 0x593   : > { %v995_v27 = vpop.xlane.xlu2 %994 }
 0x594   : > { %v997_v12 = vmul.f32 %v995_v27, %v983_v2 }
 0x596   : > { %v1379_v28 = vpop.eup %1378  ;;  %v999_v30 = vadd.f32 1e-05, %v997_v12 }
 0x597   : > { %v1001_v31 = vmul.f32 %v1379_v28, %v998_v26  ;;  %vm1007_vm12 = vweird.f32 %v1379_v28 }
 0x598   : > { %1380 = vrsqrt.f32 %v999_v30  ;;  %vm1008_vm14 = vmor %vm1006_vm13, %vm1007_vm12  ;;  %vm1016_vm1 = vweird.f32 %v999_v30 }
 0x599   : > { %v1002_v23 = vmul.f32 %v1379_v28, %v1001_v31 }
 0x59b   : > { %v1003_v14 = vmul.f32 0.5, %v1002_v23 }
 0x59d   : > { %v1004_v7 = vsub.f32 1.5, %v1003_v14 }
 0x59e   : > { %v1381_v32 = vpop.eup %1380 }
 0x59f   : > { %v1005_v16 = vmul.f32 %v1379_v28, %v1004_v7  ;;  %v1011_v33 = vmul.f32 %v1381_v32, %v999_v30  ;;  %vm1017_vm15 = vweird.f32 %v1381_v32 }
 0x5a0   : > { %vm1018_vm2 = vmor %vm1016_vm1, %vm1017_vm15 }
 0x5a1   : > { %v1009_v36 = vsel %vm1008_vm14, %v1379_v28, %v1005_v16  ;;  %v1012_v37 = vmul.f32 %v1381_v32, %v1011_v33 }
 0x5a2   : > { %v1020_v39 = vmul.f32 %v1009_v36, %v986_v11 }
 0x5a3   : > { %v1013_v35 = vmul.f32 0.5, %v1012_v37 }
 0x5a4   : > { %v1026_v40 = vmul.f32 %v1342_v34, %v1020_v39 }
 0x5a5   : > { %v1014_v41 = vsub.f32 1.5, %v1013_v35 }
 0x5a6   : > { %v1032_v42 = vadd.f32 %v1343_v38, %v1026_v40 }
 0x5a7   : > { %v1015_v15 = vmul.f32 %v1381_v32, %v1014_v41 }
 0x5a8   : > { %1034 = vst.msk [vmem:[%s381_s29] sm:$0xff] %vm412_vm0, %v1032_v42 }
 0x5a9   : > { %v1019_v43 = vsel %vm1018_vm2, %v1381_v32, %v1015_v15 }
 0x5aa   : > { %v1021_v13 = vmul.f32 %v1019_v43, %v987_v20 }
 0x5ac   : > { %v1027_v44 = vmul.f32 %v1342_v34, %v1021_v13 }
 0x5ae   : > { %v1033_v45 = vadd.f32 %v1343_v38, %v1027_v44 }
 0x5b0   : > { %1035 = vst.msk [vmem:[%s381_s29 + $0x8] sm:$0xff] %vm412_vm0, %v1033_v45 }
 0x5b1 PF: > { %p1274_p4 = scmp.ge.s32.totalorder %s1460_s14, 2  ;;  %s1093_s27 = sand.u32 1, %s1440_s30  }
 0x5b2   : > { %s1094_s18 = scalar_lea.sflag [#allocation5], %s1093_s27 }
 0x5b3   : > { %p1271_p6 = pnand %p1274_p4, %p1575_p8 }
 0x5b5   : > { %p1272_p7 = pneg %p1271_p6 }
 0x5b7   : > { %1435 = dma.done.wait (%p1272_p7), %s1094_s18, 256  }
 0x5b8   : > { %1437 = vsyncadd (%p1272_p7), %s1094_s18, 4294967040  ;;  %s23_s14 = sadd.s32 1, %s1460_s14   ;;  %s1837_s30 = smov %s1444_s10 }
 0x5b9   : > { %p20_p9 = scmp.ge.s32.totalorder %s23_s14, 4   ;;  %s1838_s10 = smov %s1448_s11 }
 0x5ba   : > { %s1839_s11 = smov %s1581_s22  ;;  %s1840_s12 = smov %s1456_s13 }
 0x5bb   : > { %s1841_s13 = smov %s1843_s17  ;;  %22 = sbr.rel (!%p20_p9) target bundleno = 9 (0x9), region = 108 }
 0x5c0   :  { %1100 = vsyncpa [#allocation5], 1 }
 0x5c1   :  { %1102 = vsyncpa [#allocation5 + $0x1], 1 }

</bundles_post_ra>
